<compile_context>
chip_gen: v5e
topology: v5e:2x2
jax: 0.10.0
libtpu: 0.0.40
codegen_flags: <defaults>
</compile_context>

<pallas_src>
import functools

import jax
import jax.numpy as jnp
from jax.experimental import pallas as pl
from jax.experimental.pallas import tpu as pltpu


# ------------------------------ Fused forward kernel ------------------------------
def fused_lstm_kernel(x_ref, *refs, num_layers, hidden):
    """Whole MyLSTM forward in one kernel invocation (no grid).

    refs = [w_ih_0, w_hh_0, b_0, ..., w_ih_{L-1}, w_hh_{L-1}, b_{L-1},
            w_fc, b_fc, out_ref]
    """
    H = hidden
    layer_refs = refs[: 3 * num_layers]
    w_fc_ref, b_fc_ref, out_ref = refs[3 * num_layers:]

    B, T, _ = x_ref.shape
    x = x_ref[...]                                                   # (B, T, D) f32

    # Time-major 2D slab of the current layer's input sequence (row r = t*B + b),
    # built from static slices — no transpose op on host or in the kernel.
    seq = jnp.concatenate([x[:, t, :] for t in range(T)], axis=0)    # (T*B, D_in)

    h_last = None
    for layer in range(num_layers):
        w_ih_ref = layer_refs[3 * layer + 0]     # (D_in, 4H)
        w_hh_ref = layer_refs[3 * layer + 1]     # (H, 4H)
        b_ref = layer_refs[3 * layer + 2]        # (1, 4H) = b_ih + b_hh
        is_last = layer == num_layers - 1

        # Hoisted, time-independent input projection: one MXU matmul with
        # M = T*B for the whole sequence instead of T tiny matmuls with M = B.
        proj = (
            jnp.dot(seq, w_ih_ref[...], preferred_element_type=jnp.float32)
            + b_ref[...]
        ).reshape(T, B, 4 * H)                   # proj[t] = x_t @ W_ih^T + b

        w_hh = w_hh_ref[...]                     # (H, 4H), loaded once per layer

        h = jnp.zeros((B, H), jnp.float32)
        c = jnp.zeros((B, H), jnp.float32)
        h_steps = []
        # Fully-unrolled recurrence: only h @ W_hh + f32 gate math per step.
        # TODO(synk): with H=32 each gate is a 32-lane sub-slice of the 128-lane
        # gate vreg; lane-aligned gate layout only pays off for H >= 128.
        for t in range(T):
            gates = proj[t] + jnp.dot(h, w_hh, preferred_element_type=jnp.float32)
            i_g = jax.nn.sigmoid(gates[:, 0 * H:1 * H])
            f_g = jax.nn.sigmoid(gates[:, 1 * H:2 * H])
            g_g = jnp.tanh(gates[:, 2 * H:3 * H])
            o_g = jax.nn.sigmoid(gates[:, 3 * H:4 * H])
            c = f_g * c + i_g * g_g
            h = o_g * jnp.tanh(c)
            if not is_last:
                h_steps.append(h)
        h_last = h

        if not is_last:
            # Hidden sequence feeding the next layer stays on-chip (vregs/VMEM);
            # it is never materialized in HBM.
            seq = jnp.concatenate(h_steps, axis=0)                   # (T*B, H)

    # Fused FC head epilogue on the final hidden state of the top layer.
    out_ref[...] = (
        jnp.dot(h_last, w_fc_ref[...], preferred_element_type=jnp.float32)
        + b_fc_ref[...]
    )


def _full_block(arr):
    nd = arr.ndim
    return pl.BlockSpec(arr.shape, lambda nd=nd: (0,) * nd)


def mylstm_forward_impl(params, x_btd):
    """x_btd: (B, T, input_size), batch_first like the PyTorch module."""
    layers = params["layers"]
    num_layers = len(layers)
    B, T, _ = x_btd.shape
    H = layers[0]["w_hh_t"].shape[0]
    C = params["w_fc_t"].shape[1]

    inputs = [x_btd.astype(jnp.float32)]
    for lp in layers:
        inputs += [lp["w_ih_t"], lp["w_hh_t"], lp["b"]]
    inputs += [params["w_fc_t"], params["b_fc"]]

    kernel = functools.partial(fused_lstm_kernel, num_layers=num_layers, hidden=H)
    return pl.pallas_call(
        kernel,
        out_shape=jax.ShapeDtypeStruct((B, C), jnp.float32),
        in_specs=[_full_block(a) for a in inputs],
        out_specs=pl.BlockSpec((B, C), lambda: (0, 0)),
        compiler_params=pltpu.CompilerParams(vmem_limit_bytes=32 * 1024 * 1024),
    )(*inputs)


mylstm_forward = jax.jit(mylstm_forward_impl)


# ---------------------------------- Params ----------------------------------
def init_params(key, input_size, hidden_size, num_layers, num_classes):
    """Deterministic init matching PyTorch nn.LSTM / nn.Linear param shapes."""
    params = {"layers": []}
    k = 1.0 / jnp.sqrt(jnp.float32(hidden_size))
    for layer in range(num_layers):
        d_in = input_size if layer == 0 else hidden_size
        key, k1, k2, k3, k4 = jax.random.split(key, 5)
        w_ih = jax.random.uniform(k1, (4 * hidden_size, d_in), jnp.float32, -k, k)
        w_hh = jax.random.uniform(k2, (4 * hidden_size, hidden_size), jnp.float32, -k, k)
        b_ih = jax.random.uniform(k3, (4 * hidden_size,), jnp.float32, -k, k)
        b_hh = jax.random.uniform(k4, (4 * hidden_size,), jnp.float32, -k, k)
        params["layers"].append(
            {
                "w_ih_t": w_ih.T,                            # (D_in, 4H)
                "w_hh_t": w_hh.T,                            # (H, 4H)
                "b": (b_ih + b_hh).reshape(1, 4 * hidden_size),
            }
        )
    key, k5, k6 = jax.random.split(key, 3)
    kf = 1.0 / jnp.sqrt(jnp.float32(hidden_size))
    w_fc = jax.random.uniform(k5, (num_classes, hidden_size), jnp.float32, -kf, kf)
    b_fc = jax.random.uniform(k6, (num_classes,), jnp.float32, -kf, kf)
    params["w_fc_t"] = w_fc.T                                # (H, C)
    params["b_fc"] = b_fc.reshape(1, num_classes)            # (1, C)
    return params


# --------------------------------- Reference ----------------------------------
def reference_forward(params, x_btd):
    x = jnp.transpose(x_btd, (1, 0, 2)).astype(jnp.float32)
    B = x.shape[1]
    for lp in params["layers"]:
        H = lp["w_hh_t"].shape[0]

        def step(carry, x_t, lp=lp, H=H):
            h, c = carry
            gates = x_t @ lp["w_ih_t"] + h @ lp["w_hh_t"] + lp["b"]
            i = jax.nn.sigmoid(gates[:, 0:H])
            f = jax.nn.sigmoid(gates[:, H:2 * H])
            g = jnp.tanh(gates[:, 2 * H:3 * H])
            o = jax.nn.sigmoid(gates[:, 3 * H:4 * H])
            c = f * c + i * g
            h = o * jnp.tanh(c)
            return (h, c), h

        init = (jnp.zeros((B, H), jnp.float32), jnp.zeros((B, H), jnp.float32))
        _, x = jax.lax.scan(step, init, x)
    return x[-1] @ params["w_fc_t"] + params["b_fc"]


if __name__ == "__main__":
    B, T = 2, 8
    input_size, hidden_size, num_layers, num_classes = 4, 32, 2, 3

    key = jax.random.PRNGKey(0)
    pkey, xkey = jax.random.split(key)
    params = init_params(pkey, input_size, hidden_size, num_layers, num_classes)
    x = jax.random.normal(xkey, (B, T, input_size), jnp.float32)

    out = mylstm_forward(params, x)
    jax.block_until_ready(out)

    ref = reference_forward(params, x)
    assert out.shape == (B, num_classes)
    assert jnp.allclose(out, ref, atol=1e-5, rtol=1e-5), (out, ref)

    print("KERNEL_OK")
</pallas_src>

<mosaic_0001>
module attributes {stable_mosaic.version = 11 : i64} {
  func.func @fused_lstm_kernel(%arg0: memref<2x8x4xf32, #tpu.memory_space<vmem>>, %arg1: memref<4x128xf32, #tpu.memory_space<vmem>>, %arg2: memref<32x128xf32, #tpu.memory_space<vmem>>, %arg3: memref<1x128xf32, #tpu.memory_space<vmem>>, %arg4: memref<32x128xf32, #tpu.memory_space<vmem>>, %arg5: memref<32x128xf32, #tpu.memory_space<vmem>>, %arg6: memref<1x128xf32, #tpu.memory_space<vmem>>, %arg7: memref<32x3xf32, #tpu.memory_space<vmem>>, %arg8: memref<1x3xf32, #tpu.memory_space<vmem>>, %arg9: memref<2x3xf32, #tpu.memory_space<vmem>>) attributes {dimension_semantics = [], scalar_prefetch = 0 : i64, scratch_operands = 0 : i64, tpu.core_type = #tpu.core_type<tc>} {
    %c0 = arith.constant 0 : index
    %c0_0 = arith.constant 0 : index
    %c0_1 = arith.constant 0 : index
    %0 = vector.load %arg0[%c0, %c0_0, %c0_1] : memref<2x8x4xf32, #tpu.memory_space<vmem>>, vector<2x8x4xf32>
    %1 = vector.extract_strided_slice %0 {offsets = [0, 0, 0], sizes = [2, 1, 4], strides = [1, 1, 1]} : vector<2x8x4xf32> to vector<2x1x4xf32>
    %2 = vector.shape_cast %1 : vector<2x1x4xf32> to vector<2x4xf32>
    %3 = vector.extract_strided_slice %0 {offsets = [0, 1, 0], sizes = [2, 1, 4], strides = [1, 1, 1]} : vector<2x8x4xf32> to vector<2x1x4xf32>
    %4 = vector.shape_cast %3 : vector<2x1x4xf32> to vector<2x4xf32>
    %5 = vector.extract_strided_slice %0 {offsets = [0, 2, 0], sizes = [2, 1, 4], strides = [1, 1, 1]} : vector<2x8x4xf32> to vector<2x1x4xf32>
    %6 = vector.shape_cast %5 : vector<2x1x4xf32> to vector<2x4xf32>
    %7 = vector.extract_strided_slice %0 {offsets = [0, 3, 0], sizes = [2, 1, 4], strides = [1, 1, 1]} : vector<2x8x4xf32> to vector<2x1x4xf32>
    %8 = vector.shape_cast %7 : vector<2x1x4xf32> to vector<2x4xf32>
    %9 = vector.extract_strided_slice %0 {offsets = [0, 4, 0], sizes = [2, 1, 4], strides = [1, 1, 1]} : vector<2x8x4xf32> to vector<2x1x4xf32>
    %10 = vector.shape_cast %9 : vector<2x1x4xf32> to vector<2x4xf32>
    %11 = vector.extract_strided_slice %0 {offsets = [0, 5, 0], sizes = [2, 1, 4], strides = [1, 1, 1]} : vector<2x8x4xf32> to vector<2x1x4xf32>
    %12 = vector.shape_cast %11 : vector<2x1x4xf32> to vector<2x4xf32>
    %13 = vector.extract_strided_slice %0 {offsets = [0, 6, 0], sizes = [2, 1, 4], strides = [1, 1, 1]} : vector<2x8x4xf32> to vector<2x1x4xf32>
    %14 = vector.shape_cast %13 : vector<2x1x4xf32> to vector<2x4xf32>
    %15 = vector.extract_strided_slice %0 {offsets = [0, 7, 0], sizes = [2, 1, 4], strides = [1, 1, 1]} : vector<2x8x4xf32> to vector<2x1x4xf32>
    %16 = vector.shape_cast %15 : vector<2x1x4xf32> to vector<2x4xf32>
    %17 = tpu.concatenate %2, %4, %6, %8, %10, %12, %14, %16 in 0 : vector<2x4xf32>, vector<2x4xf32>, vector<2x4xf32>, vector<2x4xf32>, vector<2x4xf32>, vector<2x4xf32>, vector<2x4xf32>, vector<2x4xf32> -> vector<16x4xf32>
    %c0_2 = arith.constant 0 : index
    %c0_3 = arith.constant 0 : index
    %18 = vector.load %arg1[%c0_2, %c0_3] : memref<4x128xf32, #tpu.memory_space<vmem>>, vector<4x128xf32>
    %cst = arith.constant dense<0.000000e+00> : vector<16x128xf32>
    %19 = tpu.matmul %17, %18, %cst {dimension_numbers = #tpu.dot_dimension_numbers<[1], [0], [0], [1], [0, 0, 1, 1], [], []>} : vector<16x4xf32>, vector<4x128xf32>, vector<16x128xf32> -> vector<16x128xf32>
    %c0_4 = arith.constant 0 : index
    %c0_5 = arith.constant 0 : index
    %20 = vector.load %arg3[%c0_4, %c0_5] : memref<1x128xf32, #tpu.memory_space<vmem>>, vector<1x128xf32>
    %21 = vector.broadcast %20 : vector<1x128xf32> to vector<16x128xf32>
    %22 = arith.addf %19, %21 : vector<16x128xf32>
    %23 = vector.shape_cast %22 : vector<16x128xf32> to vector<8x2x128xf32>
    %c0_6 = arith.constant 0 : index
    %c0_7 = arith.constant 0 : index
    %24 = vector.load %arg2[%c0_6, %c0_7] : memref<32x128xf32, #tpu.memory_space<vmem>>, vector<32x128xf32>
    %cst_8 = arith.constant 0.000000e+00 : f32
    %25 = vector.broadcast %cst_8 : f32 to vector<2x32xf32>
    %cst_9 = arith.constant 0.000000e+00 : f32
    %26 = vector.broadcast %cst_9 : f32 to vector<2x32xf32>
    %27 = vector.extract_strided_slice %23 {offsets = [0, 0, 0], sizes = [1, 2, 128], strides = [1, 1, 1]} : vector<8x2x128xf32> to vector<1x2x128xf32>
    %28 = vector.shape_cast %27 : vector<1x2x128xf32> to vector<2x128xf32>
    %cst_10 = arith.constant dense<0.000000e+00> : vector<2x128xf32>
    %29 = tpu.matmul %25, %24, %cst_10 {dimension_numbers = #tpu.dot_dimension_numbers<[1], [0], [0], [1], [0, 0, 1, 1], [], []>} : vector<2x32xf32>, vector<32x128xf32>, vector<2x128xf32> -> vector<2x128xf32>
    %30 = arith.addf %28, %29 : vector<2x128xf32>
    %31 = vector.extract_strided_slice %30 {offsets = [0, 0], sizes = [2, 32], strides = [1, 1]} : vector<2x128xf32> to vector<2x32xf32>
    %32 = arith.negf %31 : vector<2x32xf32>
    %33 = math.exp %32 : vector<2x32xf32>
    %cst_11 = arith.constant 1.000000e+00 : f32
    %34 = vector.broadcast %cst_11 : f32 to vector<2x32xf32>
    %35 = arith.addf %34, %33 : vector<2x32xf32>
    %36 = arith.divf %34, %35 : vector<2x32xf32>
    %37 = vector.extract_strided_slice %30 {offsets = [0, 32], sizes = [2, 32], strides = [1, 1]} : vector<2x128xf32> to vector<2x32xf32>
    %38 = arith.negf %37 : vector<2x32xf32>
    %39 = math.exp %38 : vector<2x32xf32>
    %cst_12 = arith.constant 1.000000e+00 : f32
    %40 = vector.broadcast %cst_12 : f32 to vector<2x32xf32>
    %41 = arith.addf %40, %39 : vector<2x32xf32>
    %42 = arith.divf %40, %41 : vector<2x32xf32>
    %43 = vector.extract_strided_slice %30 {offsets = [0, 64], sizes = [2, 32], strides = [1, 1]} : vector<2x128xf32> to vector<2x32xf32>
    %44 = math.tanh %43 : vector<2x32xf32>
    %45 = vector.extract_strided_slice %30 {offsets = [0, 96], sizes = [2, 32], strides = [1, 1]} : vector<2x128xf32> to vector<2x32xf32>
    %46 = arith.negf %45 : vector<2x32xf32>
    %47 = math.exp %46 : vector<2x32xf32>
    %cst_13 = arith.constant 1.000000e+00 : f32
    %48 = vector.broadcast %cst_13 : f32 to vector<2x32xf32>
    %49 = arith.addf %48, %47 : vector<2x32xf32>
    %50 = arith.divf %48, %49 : vector<2x32xf32>
    %51 = arith.mulf %42, %26 : vector<2x32xf32>
    %52 = arith.mulf %36, %44 : vector<2x32xf32>
    %53 = arith.addf %51, %52 : vector<2x32xf32>
    %54 = math.tanh %53 : vector<2x32xf32>
    %55 = arith.mulf %50, %54 : vector<2x32xf32>
    %56 = vector.extract_strided_slice %23 {offsets = [1, 0, 0], sizes = [1, 2, 128], strides = [1, 1, 1]} : vector<8x2x128xf32> to vector<1x2x128xf32>
    %57 = vector.shape_cast %56 : vector<1x2x128xf32> to vector<2x128xf32>
    %cst_14 = arith.constant dense<0.000000e+00> : vector<2x128xf32>
    %58 = tpu.matmul %55, %24, %cst_14 {dimension_numbers = #tpu.dot_dimension_numbers<[1], [0], [0], [1], [0, 0, 1, 1], [], []>} : vector<2x32xf32>, vector<32x128xf32>, vector<2x128xf32> -> vector<2x128xf32>
    %59 = arith.addf %57, %58 : vector<2x128xf32>
    %60 = vector.extract_strided_slice %59 {offsets = [0, 0], sizes = [2, 32], strides = [1, 1]} : vector<2x128xf32> to vector<2x32xf32>
    %61 = arith.negf %60 : vector<2x32xf32>
    %62 = math.exp %61 : vector<2x32xf32>
    %cst_15 = arith.constant 1.000000e+00 : f32
    %63 = vector.broadcast %cst_15 : f32 to vector<2x32xf32>
    %64 = arith.addf %63, %62 : vector<2x32xf32>
    %65 = arith.divf %63, %64 : vector<2x32xf32>
    %66 = vector.extract_strided_slice %59 {offsets = [0, 32], sizes = [2, 32], strides = [1, 1]} : vector<2x128xf32> to vector<2x32xf32>
    %67 = arith.negf %66 : vector<2x32xf32>
    %68 = math.exp %67 : vector<2x32xf32>
    %cst_16 = arith.constant 1.000000e+00 : f32
    %69 = vector.broadcast %cst_16 : f32 to vector<2x32xf32>
    %70 = arith.addf %69, %68 : vector<2x32xf32>
    %71 = arith.divf %69, %70 : vector<2x32xf32>
    %72 = vector.extract_strided_slice %59 {offsets = [0, 64], sizes = [2, 32], strides = [1, 1]} : vector<2x128xf32> to vector<2x32xf32>
    %73 = math.tanh %72 : vector<2x32xf32>
    %74 = vector.extract_strided_slice %59 {offsets = [0, 96], sizes = [2, 32], strides = [1, 1]} : vector<2x128xf32> to vector<2x32xf32>
    %75 = arith.negf %74 : vector<2x32xf32>
    %76 = math.exp %75 : vector<2x32xf32>
    %cst_17 = arith.constant 1.000000e+00 : f32
    %77 = vector.broadcast %cst_17 : f32 to vector<2x32xf32>
    %78 = arith.addf %77, %76 : vector<2x32xf32>
    %79 = arith.divf %77, %78 : vector<2x32xf32>
    %80 = arith.mulf %71, %53 : vector<2x32xf32>
    %81 = arith.mulf %65, %73 : vector<2x32xf32>
    %82 = arith.addf %80, %81 : vector<2x32xf32>
    %83 = math.tanh %82 : vector<2x32xf32>
    %84 = arith.mulf %79, %83 : vector<2x32xf32>
    %85 = vector.extract_strided_slice %23 {offsets = [2, 0, 0], sizes = [1, 2, 128], strides = [1, 1, 1]} : vector<8x2x128xf32> to vector<1x2x128xf32>
    %86 = vector.shape_cast %85 : vector<1x2x128xf32> to vector<2x128xf32>
    %cst_18 = arith.constant dense<0.000000e+00> : vector<2x128xf32>
    %87 = tpu.matmul %84, %24, %cst_18 {dimension_numbers = #tpu.dot_dimension_numbers<[1], [0], [0], [1], [0, 0, 1, 1], [], []>} : vector<2x32xf32>, vector<32x128xf32>, vector<2x128xf32> -> vector<2x128xf32>
    %88 = arith.addf %86, %87 : vector<2x128xf32>
    %89 = vector.extract_strided_slice %88 {offsets = [0, 0], sizes = [2, 32], strides = [1, 1]} : vector<2x128xf32> to vector<2x32xf32>
    %90 = arith.negf %89 : vector<2x32xf32>
    %91 = math.exp %90 : vector<2x32xf32>
    %cst_19 = arith.constant 1.000000e+00 : f32
    %92 = vector.broadcast %cst_19 : f32 to vector<2x32xf32>
    %93 = arith.addf %92, %91 : vector<2x32xf32>
    %94 = arith.divf %92, %93 : vector<2x32xf32>
    %95 = vector.extract_strided_slice %88 {offsets = [0, 32], sizes = [2, 32], strides = [1, 1]} : vector<2x128xf32> to vector<2x32xf32>
    %96 = arith.negf %95 : vector<2x32xf32>
    %97 = math.exp %96 : vector<2x32xf32>
    %cst_20 = arith.constant 1.000000e+00 : f32
    %98 = vector.broadcast %cst_20 : f32 to vector<2x32xf32>
    %99 = arith.addf %98, %97 : vector<2x32xf32>
    %100 = arith.divf %98, %99 : vector<2x32xf32>
    %101 = vector.extract_strided_slice %88 {offsets = [0, 64], sizes = [2, 32], strides = [1, 1]} : vector<2x128xf32> to vector<2x32xf32>
    %102 = math.tanh %101 : vector<2x32xf32>
    %103 = vector.extract_strided_slice %88 {offsets = [0, 96], sizes = [2, 32], strides = [1, 1]} : vector<2x128xf32> to vector<2x32xf32>
    %104 = arith.negf %103 : vector<2x32xf32>
    %105 = math.exp %104 : vector<2x32xf32>
    %cst_21 = arith.constant 1.000000e+00 : f32
    %106 = vector.broadcast %cst_21 : f32 to vector<2x32xf32>
    %107 = arith.addf %106, %105 : vector<2x32xf32>
    %108 = arith.divf %106, %107 : vector<2x32xf32>
    %109 = arith.mulf %100, %82 : vector<2x32xf32>
    %110 = arith.mulf %94, %102 : vector<2x32xf32>
    %111 = arith.addf %109, %110 : vector<2x32xf32>
    %112 = math.tanh %111 : vector<2x32xf32>
    %113 = arith.mulf %108, %112 : vector<2x32xf32>
    %114 = vector.extract_strided_slice %23 {offsets = [3, 0, 0], sizes = [1, 2, 128], strides = [1, 1, 1]} : vector<8x2x128xf32> to vector<1x2x128xf32>
    %115 = vector.shape_cast %114 : vector<1x2x128xf32> to vector<2x128xf32>
    %cst_22 = arith.constant dense<0.000000e+00> : vector<2x128xf32>
    %116 = tpu.matmul %113, %24, %cst_22 {dimension_numbers = #tpu.dot_dimension_numbers<[1], [0], [0], [1], [0, 0, 1, 1], [], []>} : vector<2x32xf32>, vector<32x128xf32>, vector<2x128xf32> -> vector<2x128xf32>
    %117 = arith.addf %115, %116 : vector<2x128xf32>
    %118 = vector.extract_strided_slice %117 {offsets = [0, 0], sizes = [2, 32], strides = [1, 1]} : vector<2x128xf32> to vector<2x32xf32>
    %119 = arith.negf %118 : vector<2x32xf32>
    %120 = math.exp %119 : vector<2x32xf32>
    %cst_23 = arith.constant 1.000000e+00 : f32
    %121 = vector.broadcast %cst_23 : f32 to vector<2x32xf32>
    %122 = arith.addf %121, %120 : vector<2x32xf32>
    %123 = arith.divf %121, %122 : vector<2x32xf32>
    %124 = vector.extract_strided_slice %117 {offsets = [0, 32], sizes = [2, 32], strides = [1, 1]} : vector<2x128xf32> to vector<2x32xf32>
    %125 = arith.negf %124 : vector<2x32xf32>
    %126 = math.exp %125 : vector<2x32xf32>
    %cst_24 = arith.constant 1.000000e+00 : f32
    %127 = vector.broadcast %cst_24 : f32 to vector<2x32xf32>
    %128 = arith.addf %127, %126 : vector<2x32xf32>
    %129 = arith.divf %127, %128 : vector<2x32xf32>
    %130 = vector.extract_strided_slice %117 {offsets = [0, 64], sizes = [2, 32], strides = [1, 1]} : vector<2x128xf32> to vector<2x32xf32>
    %131 = math.tanh %130 : vector<2x32xf32>
    %132 = vector.extract_strided_slice %117 {offsets = [0, 96], sizes = [2, 32], strides = [1, 1]} : vector<2x128xf32> to vector<2x32xf32>
    %133 = arith.negf %132 : vector<2x32xf32>
    %134 = math.exp %133 : vector<2x32xf32>
    %cst_25 = arith.constant 1.000000e+00 : f32
    %135 = vector.broadcast %cst_25 : f32 to vector<2x32xf32>
    %136 = arith.addf %135, %134 : vector<2x32xf32>
    %137 = arith.divf %135, %136 : vector<2x32xf32>
    %138 = arith.mulf %129, %111 : vector<2x32xf32>
    %139 = arith.mulf %123, %131 : vector<2x32xf32>
    %140 = arith.addf %138, %139 : vector<2x32xf32>
    %141 = math.tanh %140 : vector<2x32xf32>
    %142 = arith.mulf %137, %141 : vector<2x32xf32>
    %143 = vector.extract_strided_slice %23 {offsets = [4, 0, 0], sizes = [1, 2, 128], strides = [1, 1, 1]} : vector<8x2x128xf32> to vector<1x2x128xf32>
    %144 = vector.shape_cast %143 : vector<1x2x128xf32> to vector<2x128xf32>
    %cst_26 = arith.constant dense<0.000000e+00> : vector<2x128xf32>
    %145 = tpu.matmul %142, %24, %cst_26 {dimension_numbers = #tpu.dot_dimension_numbers<[1], [0], [0], [1], [0, 0, 1, 1], [], []>} : vector<2x32xf32>, vector<32x128xf32>, vector<2x128xf32> -> vector<2x128xf32>
    %146 = arith.addf %144, %145 : vector<2x128xf32>
    %147 = vector.extract_strided_slice %146 {offsets = [0, 0], sizes = [2, 32], strides = [1, 1]} : vector<2x128xf32> to vector<2x32xf32>
    %148 = arith.negf %147 : vector<2x32xf32>
    %149 = math.exp %148 : vector<2x32xf32>
    %cst_27 = arith.constant 1.000000e+00 : f32
    %150 = vector.broadcast %cst_27 : f32 to vector<2x32xf32>
    %151 = arith.addf %150, %149 : vector<2x32xf32>
    %152 = arith.divf %150, %151 : vector<2x32xf32>
    %153 = vector.extract_strided_slice %146 {offsets = [0, 32], sizes = [2, 32], strides = [1, 1]} : vector<2x128xf32> to vector<2x32xf32>
    %154 = arith.negf %153 : vector<2x32xf32>
    %155 = math.exp %154 : vector<2x32xf32>
    %cst_28 = arith.constant 1.000000e+00 : f32
    %156 = vector.broadcast %cst_28 : f32 to vector<2x32xf32>
    %157 = arith.addf %156, %155 : vector<2x32xf32>
    %158 = arith.divf %156, %157 : vector<2x32xf32>
    %159 = vector.extract_strided_slice %146 {offsets = [0, 64], sizes = [2, 32], strides = [1, 1]} : vector<2x128xf32> to vector<2x32xf32>
    %160 = math.tanh %159 : vector<2x32xf32>
    %161 = vector.extract_strided_slice %146 {offsets = [0, 96], sizes = [2, 32], strides = [1, 1]} : vector<2x128xf32> to vector<2x32xf32>
    %162 = arith.negf %161 : vector<2x32xf32>
    %163 = math.exp %162 : vector<2x32xf32>
    %cst_29 = arith.constant 1.000000e+00 : f32
    %164 = vector.broadcast %cst_29 : f32 to vector<2x32xf32>
    %165 = arith.addf %164, %163 : vector<2x32xf32>
    %166 = arith.divf %164, %165 : vector<2x32xf32>
    %167 = arith.mulf %158, %140 : vector<2x32xf32>
    %168 = arith.mulf %152, %160 : vector<2x32xf32>
    %169 = arith.addf %167, %168 : vector<2x32xf32>
    %170 = math.tanh %169 : vector<2x32xf32>
    %171 = arith.mulf %166, %170 : vector<2x32xf32>
    %172 = vector.extract_strided_slice %23 {offsets = [5, 0, 0], sizes = [1, 2, 128], strides = [1, 1, 1]} : vector<8x2x128xf32> to vector<1x2x128xf32>
    %173 = vector.shape_cast %172 : vector<1x2x128xf32> to vector<2x128xf32>
    %cst_30 = arith.constant dense<0.000000e+00> : vector<2x128xf32>
    %174 = tpu.matmul %171, %24, %cst_30 {dimension_numbers = #tpu.dot_dimension_numbers<[1], [0], [0], [1], [0, 0, 1, 1], [], []>} : vector<2x32xf32>, vector<32x128xf32>, vector<2x128xf32> -> vector<2x128xf32>
    %175 = arith.addf %173, %174 : vector<2x128xf32>
    %176 = vector.extract_strided_slice %175 {offsets = [0, 0], sizes = [2, 32], strides = [1, 1]} : vector<2x128xf32> to vector<2x32xf32>
    %177 = arith.negf %176 : vector<2x32xf32>
    %178 = math.exp %177 : vector<2x32xf32>
    %cst_31 = arith.constant 1.000000e+00 : f32
    %179 = vector.broadcast %cst_31 : f32 to vector<2x32xf32>
    %180 = arith.addf %179, %178 : vector<2x32xf32>
    %181 = arith.divf %179, %180 : vector<2x32xf32>
    %182 = vector.extract_strided_slice %175 {offsets = [0, 32], sizes = [2, 32], strides = [1, 1]} : vector<2x128xf32> to vector<2x32xf32>
    %183 = arith.negf %182 : vector<2x32xf32>
    %184 = math.exp %183 : vector<2x32xf32>
    %cst_32 = arith.constant 1.000000e+00 : f32
    %185 = vector.broadcast %cst_32 : f32 to vector<2x32xf32>
    %186 = arith.addf %185, %184 : vector<2x32xf32>
    %187 = arith.divf %185, %186 : vector<2x32xf32>
    %188 = vector.extract_strided_slice %175 {offsets = [0, 64], sizes = [2, 32], strides = [1, 1]} : vector<2x128xf32> to vector<2x32xf32>
    %189 = math.tanh %188 : vector<2x32xf32>
    %190 = vector.extract_strided_slice %175 {offsets = [0, 96], sizes = [2, 32], strides = [1, 1]} : vector<2x128xf32> to vector<2x32xf32>
    %191 = arith.negf %190 : vector<2x32xf32>
    %192 = math.exp %191 : vector<2x32xf32>
    %cst_33 = arith.constant 1.000000e+00 : f32
    %193 = vector.broadcast %cst_33 : f32 to vector<2x32xf32>
    %194 = arith.addf %193, %192 : vector<2x32xf32>
    %195 = arith.divf %193, %194 : vector<2x32xf32>
    %196 = arith.mulf %187, %169 : vector<2x32xf32>
    %197 = arith.mulf %181, %189 : vector<2x32xf32>
    %198 = arith.addf %196, %197 : vector<2x32xf32>
    %199 = math.tanh %198 : vector<2x32xf32>
    %200 = arith.mulf %195, %199 : vector<2x32xf32>
    %201 = vector.extract_strided_slice %23 {offsets = [6, 0, 0], sizes = [1, 2, 128], strides = [1, 1, 1]} : vector<8x2x128xf32> to vector<1x2x128xf32>
    %202 = vector.shape_cast %201 : vector<1x2x128xf32> to vector<2x128xf32>
    %cst_34 = arith.constant dense<0.000000e+00> : vector<2x128xf32>
    %203 = tpu.matmul %200, %24, %cst_34 {dimension_numbers = #tpu.dot_dimension_numbers<[1], [0], [0], [1], [0, 0, 1, 1], [], []>} : vector<2x32xf32>, vector<32x128xf32>, vector<2x128xf32> -> vector<2x128xf32>
    %204 = arith.addf %202, %203 : vector<2x128xf32>
    %205 = vector.extract_strided_slice %204 {offsets = [0, 0], sizes = [2, 32], strides = [1, 1]} : vector<2x128xf32> to vector<2x32xf32>
    %206 = arith.negf %205 : vector<2x32xf32>
    %207 = math.exp %206 : vector<2x32xf32>
    %cst_35 = arith.constant 1.000000e+00 : f32
    %208 = vector.broadcast %cst_35 : f32 to vector<2x32xf32>
    %209 = arith.addf %208, %207 : vector<2x32xf32>
    %210 = arith.divf %208, %209 : vector<2x32xf32>
    %211 = vector.extract_strided_slice %204 {offsets = [0, 32], sizes = [2, 32], strides = [1, 1]} : vector<2x128xf32> to vector<2x32xf32>
    %212 = arith.negf %211 : vector<2x32xf32>
    %213 = math.exp %212 : vector<2x32xf32>
    %cst_36 = arith.constant 1.000000e+00 : f32
    %214 = vector.broadcast %cst_36 : f32 to vector<2x32xf32>
    %215 = arith.addf %214, %213 : vector<2x32xf32>
    %216 = arith.divf %214, %215 : vector<2x32xf32>
    %217 = vector.extract_strided_slice %204 {offsets = [0, 64], sizes = [2, 32], strides = [1, 1]} : vector<2x128xf32> to vector<2x32xf32>
    %218 = math.tanh %217 : vector<2x32xf32>
    %219 = vector.extract_strided_slice %204 {offsets = [0, 96], sizes = [2, 32], strides = [1, 1]} : vector<2x128xf32> to vector<2x32xf32>
    %220 = arith.negf %219 : vector<2x32xf32>
    %221 = math.exp %220 : vector<2x32xf32>
    %cst_37 = arith.constant 1.000000e+00 : f32
    %222 = vector.broadcast %cst_37 : f32 to vector<2x32xf32>
    %223 = arith.addf %222, %221 : vector<2x32xf32>
    %224 = arith.divf %222, %223 : vector<2x32xf32>
    %225 = arith.mulf %216, %198 : vector<2x32xf32>
    %226 = arith.mulf %210, %218 : vector<2x32xf32>
    %227 = arith.addf %225, %226 : vector<2x32xf32>
    %228 = math.tanh %227 : vector<2x32xf32>
    %229 = arith.mulf %224, %228 : vector<2x32xf32>
    %230 = vector.extract_strided_slice %23 {offsets = [7, 0, 0], sizes = [1, 2, 128], strides = [1, 1, 1]} : vector<8x2x128xf32> to vector<1x2x128xf32>
    %231 = vector.shape_cast %230 : vector<1x2x128xf32> to vector<2x128xf32>
    %cst_38 = arith.constant dense<0.000000e+00> : vector<2x128xf32>
    %232 = tpu.matmul %229, %24, %cst_38 {dimension_numbers = #tpu.dot_dimension_numbers<[1], [0], [0], [1], [0, 0, 1, 1], [], []>} : vector<2x32xf32>, vector<32x128xf32>, vector<2x128xf32> -> vector<2x128xf32>
    %233 = arith.addf %231, %232 : vector<2x128xf32>
    %234 = vector.extract_strided_slice %233 {offsets = [0, 0], sizes = [2, 32], strides = [1, 1]} : vector<2x128xf32> to vector<2x32xf32>
    %235 = arith.negf %234 : vector<2x32xf32>
    %236 = math.exp %235 : vector<2x32xf32>
    %cst_39 = arith.constant 1.000000e+00 : f32
    %237 = vector.broadcast %cst_39 : f32 to vector<2x32xf32>
    %238 = arith.addf %237, %236 : vector<2x32xf32>
    %239 = arith.divf %237, %238 : vector<2x32xf32>
    %240 = vector.extract_strided_slice %233 {offsets = [0, 32], sizes = [2, 32], strides = [1, 1]} : vector<2x128xf32> to vector<2x32xf32>
    %241 = arith.negf %240 : vector<2x32xf32>
    %242 = math.exp %241 : vector<2x32xf32>
    %cst_40 = arith.constant 1.000000e+00 : f32
    %243 = vector.broadcast %cst_40 : f32 to vector<2x32xf32>
    %244 = arith.addf %243, %242 : vector<2x32xf32>
    %245 = arith.divf %243, %244 : vector<2x32xf32>
    %246 = vector.extract_strided_slice %233 {offsets = [0, 64], sizes = [2, 32], strides = [1, 1]} : vector<2x128xf32> to vector<2x32xf32>
    %247 = math.tanh %246 : vector<2x32xf32>
    %248 = vector.extract_strided_slice %233 {offsets = [0, 96], sizes = [2, 32], strides = [1, 1]} : vector<2x128xf32> to vector<2x32xf32>
    %249 = arith.negf %248 : vector<2x32xf32>
    %250 = math.exp %249 : vector<2x32xf32>
    %cst_41 = arith.constant 1.000000e+00 : f32
    %251 = vector.broadcast %cst_41 : f32 to vector<2x32xf32>
    %252 = arith.addf %251, %250 : vector<2x32xf32>
    %253 = arith.divf %251, %252 : vector<2x32xf32>
    %254 = arith.mulf %245, %227 : vector<2x32xf32>
    %255 = arith.mulf %239, %247 : vector<2x32xf32>
    %256 = arith.addf %254, %255 : vector<2x32xf32>
    %257 = math.tanh %256 : vector<2x32xf32>
    %258 = arith.mulf %253, %257 : vector<2x32xf32>
    %259 = tpu.concatenate %55, %84, %113, %142, %171, %200, %229, %258 in 0 : vector<2x32xf32>, vector<2x32xf32>, vector<2x32xf32>, vector<2x32xf32>, vector<2x32xf32>, vector<2x32xf32>, vector<2x32xf32>, vector<2x32xf32> -> vector<16x32xf32>
    %c0_42 = arith.constant 0 : index
    %c0_43 = arith.constant 0 : index
    %260 = vector.load %arg4[%c0_42, %c0_43] : memref<32x128xf32, #tpu.memory_space<vmem>>, vector<32x128xf32>
    %cst_44 = arith.constant dense<0.000000e+00> : vector<16x128xf32>
    %261 = tpu.matmul %259, %260, %cst_44 {dimension_numbers = #tpu.dot_dimension_numbers<[1], [0], [0], [1], [0, 0, 1, 1], [], []>} : vector<16x32xf32>, vector<32x128xf32>, vector<16x128xf32> -> vector<16x128xf32>
    %c0_45 = arith.constant 0 : index
    %c0_46 = arith.constant 0 : index
    %262 = vector.load %arg6[%c0_45, %c0_46] : memref<1x128xf32, #tpu.memory_space<vmem>>, vector<1x128xf32>
    %263 = vector.broadcast %262 : vector<1x128xf32> to vector<16x128xf32>
    %264 = arith.addf %261, %263 : vector<16x128xf32>
    %265 = vector.shape_cast %264 : vector<16x128xf32> to vector<8x2x128xf32>
    %c0_47 = arith.constant 0 : index
    %c0_48 = arith.constant 0 : index
    %266 = vector.load %arg5[%c0_47, %c0_48] : memref<32x128xf32, #tpu.memory_space<vmem>>, vector<32x128xf32>
    %cst_49 = arith.constant 0.000000e+00 : f32
    %267 = vector.broadcast %cst_49 : f32 to vector<2x32xf32>
    %cst_50 = arith.constant 0.000000e+00 : f32
    %268 = vector.broadcast %cst_50 : f32 to vector<2x32xf32>
    %269 = vector.extract_strided_slice %265 {offsets = [0, 0, 0], sizes = [1, 2, 128], strides = [1, 1, 1]} : vector<8x2x128xf32> to vector<1x2x128xf32>
    %270 = vector.shape_cast %269 : vector<1x2x128xf32> to vector<2x128xf32>
    %cst_51 = arith.constant dense<0.000000e+00> : vector<2x128xf32>
    %271 = tpu.matmul %267, %266, %cst_51 {dimension_numbers = #tpu.dot_dimension_numbers<[1], [0], [0], [1], [0, 0, 1, 1], [], []>} : vector<2x32xf32>, vector<32x128xf32>, vector<2x128xf32> -> vector<2x128xf32>
    %272 = arith.addf %270, %271 : vector<2x128xf32>
    %273 = vector.extract_strided_slice %272 {offsets = [0, 0], sizes = [2, 32], strides = [1, 1]} : vector<2x128xf32> to vector<2x32xf32>
    %274 = arith.negf %273 : vector<2x32xf32>
    %275 = math.exp %274 : vector<2x32xf32>
    %cst_52 = arith.constant 1.000000e+00 : f32
    %276 = vector.broadcast %cst_52 : f32 to vector<2x32xf32>
    %277 = arith.addf %276, %275 : vector<2x32xf32>
    %278 = arith.divf %276, %277 : vector<2x32xf32>
    %279 = vector.extract_strided_slice %272 {offsets = [0, 32], sizes = [2, 32], strides = [1, 1]} : vector<2x128xf32> to vector<2x32xf32>
    %280 = arith.negf %279 : vector<2x32xf32>
    %281 = math.exp %280 : vector<2x32xf32>
    %cst_53 = arith.constant 1.000000e+00 : f32
    %282 = vector.broadcast %cst_53 : f32 to vector<2x32xf32>
    %283 = arith.addf %282, %281 : vector<2x32xf32>
    %284 = arith.divf %282, %283 : vector<2x32xf32>
    %285 = vector.extract_strided_slice %272 {offsets = [0, 64], sizes = [2, 32], strides = [1, 1]} : vector<2x128xf32> to vector<2x32xf32>
    %286 = math.tanh %285 : vector<2x32xf32>
    %287 = vector.extract_strided_slice %272 {offsets = [0, 96], sizes = [2, 32], strides = [1, 1]} : vector<2x128xf32> to vector<2x32xf32>
    %288 = arith.negf %287 : vector<2x32xf32>
    %289 = math.exp %288 : vector<2x32xf32>
    %cst_54 = arith.constant 1.000000e+00 : f32
    %290 = vector.broadcast %cst_54 : f32 to vector<2x32xf32>
    %291 = arith.addf %290, %289 : vector<2x32xf32>
    %292 = arith.divf %290, %291 : vector<2x32xf32>
    %293 = arith.mulf %284, %268 : vector<2x32xf32>
    %294 = arith.mulf %278, %286 : vector<2x32xf32>
    %295 = arith.addf %293, %294 : vector<2x32xf32>
    %296 = math.tanh %295 : vector<2x32xf32>
    %297 = arith.mulf %292, %296 : vector<2x32xf32>
    %298 = vector.extract_strided_slice %265 {offsets = [1, 0, 0], sizes = [1, 2, 128], strides = [1, 1, 1]} : vector<8x2x128xf32> to vector<1x2x128xf32>
    %299 = vector.shape_cast %298 : vector<1x2x128xf32> to vector<2x128xf32>
    %cst_55 = arith.constant dense<0.000000e+00> : vector<2x128xf32>
    %300 = tpu.matmul %297, %266, %cst_55 {dimension_numbers = #tpu.dot_dimension_numbers<[1], [0], [0], [1], [0, 0, 1, 1], [], []>} : vector<2x32xf32>, vector<32x128xf32>, vector<2x128xf32> -> vector<2x128xf32>
    %301 = arith.addf %299, %300 : vector<2x128xf32>
    %302 = vector.extract_strided_slice %301 {offsets = [0, 0], sizes = [2, 32], strides = [1, 1]} : vector<2x128xf32> to vector<2x32xf32>
    %303 = arith.negf %302 : vector<2x32xf32>
    %304 = math.exp %303 : vector<2x32xf32>
    %cst_56 = arith.constant 1.000000e+00 : f32
    %305 = vector.broadcast %cst_56 : f32 to vector<2x32xf32>
    %306 = arith.addf %305, %304 : vector<2x32xf32>
    %307 = arith.divf %305, %306 : vector<2x32xf32>
    %308 = vector.extract_strided_slice %301 {offsets = [0, 32], sizes = [2, 32], strides = [1, 1]} : vector<2x128xf32> to vector<2x32xf32>
    %309 = arith.negf %308 : vector<2x32xf32>
    %310 = math.exp %309 : vector<2x32xf32>
    %cst_57 = arith.constant 1.000000e+00 : f32
    %311 = vector.broadcast %cst_57 : f32 to vector<2x32xf32>
    %312 = arith.addf %311, %310 : vector<2x32xf32>
    %313 = arith.divf %311, %312 : vector<2x32xf32>
    %314 = vector.extract_strided_slice %301 {offsets = [0, 64], sizes = [2, 32], strides = [1, 1]} : vector<2x128xf32> to vector<2x32xf32>
    %315 = math.tanh %314 : vector<2x32xf32>
    %316 = vector.extract_strided_slice %301 {offsets = [0, 96], sizes = [2, 32], strides = [1, 1]} : vector<2x128xf32> to vector<2x32xf32>
    %317 = arith.negf %316 : vector<2x32xf32>
    %318 = math.exp %317 : vector<2x32xf32>
    %cst_58 = arith.constant 1.000000e+00 : f32
    %319 = vector.broadcast %cst_58 : f32 to vector<2x32xf32>
    %320 = arith.addf %319, %318 : vector<2x32xf32>
    %321 = arith.divf %319, %320 : vector<2x32xf32>
    %322 = arith.mulf %313, %295 : vector<2x32xf32>
    %323 = arith.mulf %307, %315 : vector<2x32xf32>
    %324 = arith.addf %322, %323 : vector<2x32xf32>
    %325 = math.tanh %324 : vector<2x32xf32>
    %326 = arith.mulf %321, %325 : vector<2x32xf32>
    %327 = vector.extract_strided_slice %265 {offsets = [2, 0, 0], sizes = [1, 2, 128], strides = [1, 1, 1]} : vector<8x2x128xf32> to vector<1x2x128xf32>
    %328 = vector.shape_cast %327 : vector<1x2x128xf32> to vector<2x128xf32>
    %cst_59 = arith.constant dense<0.000000e+00> : vector<2x128xf32>
    %329 = tpu.matmul %326, %266, %cst_59 {dimension_numbers = #tpu.dot_dimension_numbers<[1], [0], [0], [1], [0, 0, 1, 1], [], []>} : vector<2x32xf32>, vector<32x128xf32>, vector<2x128xf32> -> vector<2x128xf32>
    %330 = arith.addf %328, %329 : vector<2x128xf32>
    %331 = vector.extract_strided_slice %330 {offsets = [0, 0], sizes = [2, 32], strides = [1, 1]} : vector<2x128xf32> to vector<2x32xf32>
    %332 = arith.negf %331 : vector<2x32xf32>
    %333 = math.exp %332 : vector<2x32xf32>
    %cst_60 = arith.constant 1.000000e+00 : f32
    %334 = vector.broadcast %cst_60 : f32 to vector<2x32xf32>
    %335 = arith.addf %334, %333 : vector<2x32xf32>
    %336 = arith.divf %334, %335 : vector<2x32xf32>
    %337 = vector.extract_strided_slice %330 {offsets = [0, 32], sizes = [2, 32], strides = [1, 1]} : vector<2x128xf32> to vector<2x32xf32>
    %338 = arith.negf %337 : vector<2x32xf32>
    %339 = math.exp %338 : vector<2x32xf32>
    %cst_61 = arith.constant 1.000000e+00 : f32
    %340 = vector.broadcast %cst_61 : f32 to vector<2x32xf32>
    %341 = arith.addf %340, %339 : vector<2x32xf32>
    %342 = arith.divf %340, %341 : vector<2x32xf32>
    %343 = vector.extract_strided_slice %330 {offsets = [0, 64], sizes = [2, 32], strides = [1, 1]} : vector<2x128xf32> to vector<2x32xf32>
    %344 = math.tanh %343 : vector<2x32xf32>
    %345 = vector.extract_strided_slice %330 {offsets = [0, 96], sizes = [2, 32], strides = [1, 1]} : vector<2x128xf32> to vector<2x32xf32>
    %346 = arith.negf %345 : vector<2x32xf32>
    %347 = math.exp %346 : vector<2x32xf32>
    %cst_62 = arith.constant 1.000000e+00 : f32
    %348 = vector.broadcast %cst_62 : f32 to vector<2x32xf32>
    %349 = arith.addf %348, %347 : vector<2x32xf32>
    %350 = arith.divf %348, %349 : vector<2x32xf32>
    %351 = arith.mulf %342, %324 : vector<2x32xf32>
    %352 = arith.mulf %336, %344 : vector<2x32xf32>
    %353 = arith.addf %351, %352 : vector<2x32xf32>
    %354 = math.tanh %353 : vector<2x32xf32>
    %355 = arith.mulf %350, %354 : vector<2x32xf32>
    %356 = vector.extract_strided_slice %265 {offsets = [3, 0, 0], sizes = [1, 2, 128], strides = [1, 1, 1]} : vector<8x2x128xf32> to vector<1x2x128xf32>
    %357 = vector.shape_cast %356 : vector<1x2x128xf32> to vector<2x128xf32>
    %cst_63 = arith.constant dense<0.000000e+00> : vector<2x128xf32>
    %358 = tpu.matmul %355, %266, %cst_63 {dimension_numbers = #tpu.dot_dimension_numbers<[1], [0], [0], [1], [0, 0, 1, 1], [], []>} : vector<2x32xf32>, vector<32x128xf32>, vector<2x128xf32> -> vector<2x128xf32>
    %359 = arith.addf %357, %358 : vector<2x128xf32>
    %360 = vector.extract_strided_slice %359 {offsets = [0, 0], sizes = [2, 32], strides = [1, 1]} : vector<2x128xf32> to vector<2x32xf32>
    %361 = arith.negf %360 : vector<2x32xf32>
    %362 = math.exp %361 : vector<2x32xf32>
    %cst_64 = arith.constant 1.000000e+00 : f32
    %363 = vector.broadcast %cst_64 : f32 to vector<2x32xf32>
    %364 = arith.addf %363, %362 : vector<2x32xf32>
    %365 = arith.divf %363, %364 : vector<2x32xf32>
    %366 = vector.extract_strided_slice %359 {offsets = [0, 32], sizes = [2, 32], strides = [1, 1]} : vector<2x128xf32> to vector<2x32xf32>
    %367 = arith.negf %366 : vector<2x32xf32>
    %368 = math.exp %367 : vector<2x32xf32>
    %cst_65 = arith.constant 1.000000e+00 : f32
    %369 = vector.broadcast %cst_65 : f32 to vector<2x32xf32>
    %370 = arith.addf %369, %368 : vector<2x32xf32>
    %371 = arith.divf %369, %370 : vector<2x32xf32>
    %372 = vector.extract_strided_slice %359 {offsets = [0, 64], sizes = [2, 32], strides = [1, 1]} : vector<2x128xf32> to vector<2x32xf32>
    %373 = math.tanh %372 : vector<2x32xf32>
    %374 = vector.extract_strided_slice %359 {offsets = [0, 96], sizes = [2, 32], strides = [1, 1]} : vector<2x128xf32> to vector<2x32xf32>
    %375 = arith.negf %374 : vector<2x32xf32>
    %376 = math.exp %375 : vector<2x32xf32>
    %cst_66 = arith.constant 1.000000e+00 : f32
    %377 = vector.broadcast %cst_66 : f32 to vector<2x32xf32>
    %378 = arith.addf %377, %376 : vector<2x32xf32>
    %379 = arith.divf %377, %378 : vector<2x32xf32>
    %380 = arith.mulf %371, %353 : vector<2x32xf32>
    %381 = arith.mulf %365, %373 : vector<2x32xf32>
    %382 = arith.addf %380, %381 : vector<2x32xf32>
    %383 = math.tanh %382 : vector<2x32xf32>
    %384 = arith.mulf %379, %383 : vector<2x32xf32>
    %385 = vector.extract_strided_slice %265 {offsets = [4, 0, 0], sizes = [1, 2, 128], strides = [1, 1, 1]} : vector<8x2x128xf32> to vector<1x2x128xf32>
    %386 = vector.shape_cast %385 : vector<1x2x128xf32> to vector<2x128xf32>
    %cst_67 = arith.constant dense<0.000000e+00> : vector<2x128xf32>
    %387 = tpu.matmul %384, %266, %cst_67 {dimension_numbers = #tpu.dot_dimension_numbers<[1], [0], [0], [1], [0, 0, 1, 1], [], []>} : vector<2x32xf32>, vector<32x128xf32>, vector<2x128xf32> -> vector<2x128xf32>
    %388 = arith.addf %386, %387 : vector<2x128xf32>
    %389 = vector.extract_strided_slice %388 {offsets = [0, 0], sizes = [2, 32], strides = [1, 1]} : vector<2x128xf32> to vector<2x32xf32>
    %390 = arith.negf %389 : vector<2x32xf32>
    %391 = math.exp %390 : vector<2x32xf32>
    %cst_68 = arith.constant 1.000000e+00 : f32
    %392 = vector.broadcast %cst_68 : f32 to vector<2x32xf32>
    %393 = arith.addf %392, %391 : vector<2x32xf32>
    %394 = arith.divf %392, %393 : vector<2x32xf32>
    %395 = vector.extract_strided_slice %388 {offsets = [0, 32], sizes = [2, 32], strides = [1, 1]} : vector<2x128xf32> to vector<2x32xf32>
    %396 = arith.negf %395 : vector<2x32xf32>
    %397 = math.exp %396 : vector<2x32xf32>
    %cst_69 = arith.constant 1.000000e+00 : f32
    %398 = vector.broadcast %cst_69 : f32 to vector<2x32xf32>
    %399 = arith.addf %398, %397 : vector<2x32xf32>
    %400 = arith.divf %398, %399 : vector<2x32xf32>
    %401 = vector.extract_strided_slice %388 {offsets = [0, 64], sizes = [2, 32], strides = [1, 1]} : vector<2x128xf32> to vector<2x32xf32>
    %402 = math.tanh %401 : vector<2x32xf32>
    %403 = vector.extract_strided_slice %388 {offsets = [0, 96], sizes = [2, 32], strides = [1, 1]} : vector<2x128xf32> to vector<2x32xf32>
    %404 = arith.negf %403 : vector<2x32xf32>
    %405 = math.exp %404 : vector<2x32xf32>
    %cst_70 = arith.constant 1.000000e+00 : f32
    %406 = vector.broadcast %cst_70 : f32 to vector<2x32xf32>
    %407 = arith.addf %406, %405 : vector<2x32xf32>
    %408 = arith.divf %406, %407 : vector<2x32xf32>
    %409 = arith.mulf %400, %382 : vector<2x32xf32>
    %410 = arith.mulf %394, %402 : vector<2x32xf32>
    %411 = arith.addf %409, %410 : vector<2x32xf32>
    %412 = math.tanh %411 : vector<2x32xf32>
    %413 = arith.mulf %408, %412 : vector<2x32xf32>
    %414 = vector.extract_strided_slice %265 {offsets = [5, 0, 0], sizes = [1, 2, 128], strides = [1, 1, 1]} : vector<8x2x128xf32> to vector<1x2x128xf32>
    %415 = vector.shape_cast %414 : vector<1x2x128xf32> to vector<2x128xf32>
    %cst_71 = arith.constant dense<0.000000e+00> : vector<2x128xf32>
    %416 = tpu.matmul %413, %266, %cst_71 {dimension_numbers = #tpu.dot_dimension_numbers<[1], [0], [0], [1], [0, 0, 1, 1], [], []>} : vector<2x32xf32>, vector<32x128xf32>, vector<2x128xf32> -> vector<2x128xf32>
    %417 = arith.addf %415, %416 : vector<2x128xf32>
    %418 = vector.extract_strided_slice %417 {offsets = [0, 0], sizes = [2, 32], strides = [1, 1]} : vector<2x128xf32> to vector<2x32xf32>
    %419 = arith.negf %418 : vector<2x32xf32>
    %420 = math.exp %419 : vector<2x32xf32>
    %cst_72 = arith.constant 1.000000e+00 : f32
    %421 = vector.broadcast %cst_72 : f32 to vector<2x32xf32>
    %422 = arith.addf %421, %420 : vector<2x32xf32>
    %423 = arith.divf %421, %422 : vector<2x32xf32>
    %424 = vector.extract_strided_slice %417 {offsets = [0, 32], sizes = [2, 32], strides = [1, 1]} : vector<2x128xf32> to vector<2x32xf32>
    %425 = arith.negf %424 : vector<2x32xf32>
    %426 = math.exp %425 : vector<2x32xf32>
    %cst_73 = arith.constant 1.000000e+00 : f32
    %427 = vector.broadcast %cst_73 : f32 to vector<2x32xf32>
    %428 = arith.addf %427, %426 : vector<2x32xf32>
    %429 = arith.divf %427, %428 : vector<2x32xf32>
    %430 = vector.extract_strided_slice %417 {offsets = [0, 64], sizes = [2, 32], strides = [1, 1]} : vector<2x128xf32> to vector<2x32xf32>
    %431 = math.tanh %430 : vector<2x32xf32>
    %432 = vector.extract_strided_slice %417 {offsets = [0, 96], sizes = [2, 32], strides = [1, 1]} : vector<2x128xf32> to vector<2x32xf32>
    %433 = arith.negf %432 : vector<2x32xf32>
    %434 = math.exp %433 : vector<2x32xf32>
    %cst_74 = arith.constant 1.000000e+00 : f32
    %435 = vector.broadcast %cst_74 : f32 to vector<2x32xf32>
    %436 = arith.addf %435, %434 : vector<2x32xf32>
    %437 = arith.divf %435, %436 : vector<2x32xf32>
    %438 = arith.mulf %429, %411 : vector<2x32xf32>
    %439 = arith.mulf %423, %431 : vector<2x32xf32>
    %440 = arith.addf %438, %439 : vector<2x32xf32>
    %441 = math.tanh %440 : vector<2x32xf32>
    %442 = arith.mulf %437, %441 : vector<2x32xf32>
    %443 = vector.extract_strided_slice %265 {offsets = [6, 0, 0], sizes = [1, 2, 128], strides = [1, 1, 1]} : vector<8x2x128xf32> to vector<1x2x128xf32>
    %444 = vector.shape_cast %443 : vector<1x2x128xf32> to vector<2x128xf32>
    %cst_75 = arith.constant dense<0.000000e+00> : vector<2x128xf32>
    %445 = tpu.matmul %442, %266, %cst_75 {dimension_numbers = #tpu.dot_dimension_numbers<[1], [0], [0], [1], [0, 0, 1, 1], [], []>} : vector<2x32xf32>, vector<32x128xf32>, vector<2x128xf32> -> vector<2x128xf32>
    %446 = arith.addf %444, %445 : vector<2x128xf32>
    %447 = vector.extract_strided_slice %446 {offsets = [0, 0], sizes = [2, 32], strides = [1, 1]} : vector<2x128xf32> to vector<2x32xf32>
    %448 = arith.negf %447 : vector<2x32xf32>
    %449 = math.exp %448 : vector<2x32xf32>
    %cst_76 = arith.constant 1.000000e+00 : f32
    %450 = vector.broadcast %cst_76 : f32 to vector<2x32xf32>
    %451 = arith.addf %450, %449 : vector<2x32xf32>
    %452 = arith.divf %450, %451 : vector<2x32xf32>
    %453 = vector.extract_strided_slice %446 {offsets = [0, 32], sizes = [2, 32], strides = [1, 1]} : vector<2x128xf32> to vector<2x32xf32>
    %454 = arith.negf %453 : vector<2x32xf32>
    %455 = math.exp %454 : vector<2x32xf32>
    %cst_77 = arith.constant 1.000000e+00 : f32
    %456 = vector.broadcast %cst_77 : f32 to vector<2x32xf32>
    %457 = arith.addf %456, %455 : vector<2x32xf32>
    %458 = arith.divf %456, %457 : vector<2x32xf32>
    %459 = vector.extract_strided_slice %446 {offsets = [0, 64], sizes = [2, 32], strides = [1, 1]} : vector<2x128xf32> to vector<2x32xf32>
    %460 = math.tanh %459 : vector<2x32xf32>
    %461 = vector.extract_strided_slice %446 {offsets = [0, 96], sizes = [2, 32], strides = [1, 1]} : vector<2x128xf32> to vector<2x32xf32>
    %462 = arith.negf %461 : vector<2x32xf32>
    %463 = math.exp %462 : vector<2x32xf32>
    %cst_78 = arith.constant 1.000000e+00 : f32
    %464 = vector.broadcast %cst_78 : f32 to vector<2x32xf32>
    %465 = arith.addf %464, %463 : vector<2x32xf32>
    %466 = arith.divf %464, %465 : vector<2x32xf32>
    %467 = arith.mulf %458, %440 : vector<2x32xf32>
    %468 = arith.mulf %452, %460 : vector<2x32xf32>
    %469 = arith.addf %467, %468 : vector<2x32xf32>
    %470 = math.tanh %469 : vector<2x32xf32>
    %471 = arith.mulf %466, %470 : vector<2x32xf32>
    %472 = vector.extract_strided_slice %265 {offsets = [7, 0, 0], sizes = [1, 2, 128], strides = [1, 1, 1]} : vector<8x2x128xf32> to vector<1x2x128xf32>
    %473 = vector.shape_cast %472 : vector<1x2x128xf32> to vector<2x128xf32>
    %cst_79 = arith.constant dense<0.000000e+00> : vector<2x128xf32>
    %474 = tpu.matmul %471, %266, %cst_79 {dimension_numbers = #tpu.dot_dimension_numbers<[1], [0], [0], [1], [0, 0, 1, 1], [], []>} : vector<2x32xf32>, vector<32x128xf32>, vector<2x128xf32> -> vector<2x128xf32>
    %475 = arith.addf %473, %474 : vector<2x128xf32>
    %476 = vector.extract_strided_slice %475 {offsets = [0, 0], sizes = [2, 32], strides = [1, 1]} : vector<2x128xf32> to vector<2x32xf32>
    %477 = arith.negf %476 : vector<2x32xf32>
    %478 = math.exp %477 : vector<2x32xf32>
    %cst_80 = arith.constant 1.000000e+00 : f32
    %479 = vector.broadcast %cst_80 : f32 to vector<2x32xf32>
    %480 = arith.addf %479, %478 : vector<2x32xf32>
    %481 = arith.divf %479, %480 : vector<2x32xf32>
    %482 = vector.extract_strided_slice %475 {offsets = [0, 32], sizes = [2, 32], strides = [1, 1]} : vector<2x128xf32> to vector<2x32xf32>
    %483 = arith.negf %482 : vector<2x32xf32>
    %484 = math.exp %483 : vector<2x32xf32>
    %cst_81 = arith.constant 1.000000e+00 : f32
    %485 = vector.broadcast %cst_81 : f32 to vector<2x32xf32>
    %486 = arith.addf %485, %484 : vector<2x32xf32>
    %487 = arith.divf %485, %486 : vector<2x32xf32>
    %488 = vector.extract_strided_slice %475 {offsets = [0, 64], sizes = [2, 32], strides = [1, 1]} : vector<2x128xf32> to vector<2x32xf32>
    %489 = math.tanh %488 : vector<2x32xf32>
    %490 = vector.extract_strided_slice %475 {offsets = [0, 96], sizes = [2, 32], strides = [1, 1]} : vector<2x128xf32> to vector<2x32xf32>
    %491 = arith.negf %490 : vector<2x32xf32>
    %492 = math.exp %491 : vector<2x32xf32>
    %cst_82 = arith.constant 1.000000e+00 : f32
    %493 = vector.broadcast %cst_82 : f32 to vector<2x32xf32>
    %494 = arith.addf %493, %492 : vector<2x32xf32>
    %495 = arith.divf %493, %494 : vector<2x32xf32>
    %496 = arith.mulf %487, %469 : vector<2x32xf32>
    %497 = arith.mulf %481, %489 : vector<2x32xf32>
    %498 = arith.addf %496, %497 : vector<2x32xf32>
    %499 = math.tanh %498 : vector<2x32xf32>
    %500 = arith.mulf %495, %499 : vector<2x32xf32>
    %c0_83 = arith.constant 0 : index
    %c0_84 = arith.constant 0 : index
    %501 = vector.load %arg7[%c0_83, %c0_84] : memref<32x3xf32, #tpu.memory_space<vmem>>, vector<32x3xf32>
    %cst_85 = arith.constant dense<0.000000e+00> : vector<2x3xf32>
    %502 = tpu.matmul %500, %501, %cst_85 {dimension_numbers = #tpu.dot_dimension_numbers<[1], [0], [0], [1], [0, 0, 1, 1], [], []>} : vector<2x32xf32>, vector<32x3xf32>, vector<2x3xf32> -> vector<2x3xf32>
    %c0_86 = arith.constant 0 : index
    %c0_87 = arith.constant 0 : index
    %503 = vector.load %arg8[%c0_86, %c0_87] : memref<1x3xf32, #tpu.memory_space<vmem>>, vector<1x3xf32>
    %504 = vector.broadcast %503 : vector<1x3xf32> to vector<2x3xf32>
    %505 = arith.addf %502, %504 : vector<2x3xf32>
    %c0_88 = arith.constant 0 : index
    %c0_89 = arith.constant 0 : index
    %506 = vector.load %arg9[%c0_88, %c0_89] : memref<2x3xf32, #tpu.memory_space<vmem>>, vector<2x3xf32>
    tpu.vector_store %arg9[%c0_88, %c0_89], %505 {strides = array<i32>} : memref<2x3xf32, #tpu.memory_space<vmem>>, vector<2x3xf32>,
    return
  }
}

</mosaic_0001>

<bundles_post_ra>
// kernel: mylstm_forward_impl.1
= control target key start
LH: loop header
LB: loop body
LE: loop exit
PB: predicated region body
PF: predicated region fallthrough
CT: control target
= control target key end

     0   :  { %14 = vsyncpa [#allocation3], 0  ;;  %s1897_s0 = inlined_call_operand.vmem [shape: f32[2,8,4], index: 0, kind: input, shape index: {}]   ;;  %s1898_s1 = inlined_call_operand.vmem [shape: f32[4,128], index: 1, kind: input, shape index: {}]   ;;  %s1899_s2 = inlined_call_operand.vmem [shape: f32[32,128], index: 2, kind: input, shape index: {}]   ;;  %s1900_s3 = inlined_call_operand.vmem [shape: f32[1,128], index: 3, kind: input, shape index: {}]   ;;  %s1901_s4 = inlined_call_operand.hbm [shape: f32[32,128], index: 4, kind: input, shape index: {}]   ;;  %s1902_s5 = inlined_call_operand.hbm [shape: f32[32,128], index: 5, kind: input, shape index: {}]   ;;  %s1903_s6 = inlined_call_operand.vmem [shape: f32[1,128], index: 6, kind: input, shape index: {}]   ;;  %s1904_s7 = inlined_call_operand.vmem [shape: f32[32,3], index: 7, kind: input, shape index: {}]   ;;  %s1905_s8 = inlined_call_operand.vmem [shape: f32[1,3], index: 8, kind: input, shape index: {}]   ;;  %s1906_s9 = inlined_call_operand.hbm [shape: f32[2,3], index: 9, kind: output, shape index: {}]  }
   0x1   :  { %15 = vsyncpa [#allocation6], 0 }
   0x2   :  { %16 = vsyncpa [#allocation4], 0  ;;  %s29_s11 = sshll.u32 %s1901_s4, 4  ;;  %s1596_s12 = smov [#allocation2]   ;;  %s30_s11 = int_to_ptr.hbm [resolvable:$true] %s29_s11 }
   0x3   :  { %s31_s13 = sshll.u32 %s1596_s12, 4  ;;  %s42_s16 = sshll.u32 %s1902_s5, 4  ;;  %s32_s13 = int_to_ptr.vmem [resolvable:$true] %s31_s13  ;;  %s43_s16 = int_to_ptr.hbm [resolvable:$true] %s42_s16 }
   0x4   :  { %s1597_s17 = smov 128   ;;  %s1598_s18 = smov 8  }
   0x5   :  { %37 = dma.hbm_to_vmem [thread:$0]  %s30_s11, 512, %s32_s13, [#allocation3], %s1597_s17, %s1597_s17, %s1598_s18  }
   0x6   :  { %s1599_s19 = smov [#allocation5]  }
   0x7   :  { %s44_s20 = sshll.u32 %s1599_s19, 4  ;;  %s45_s20 = int_to_ptr.vmem [resolvable:$true] %s44_s20 }
   0x8   :  { %50 = dma.hbm_to_vmem [thread:$0]  %s43_s16, 512, %s45_s20, [#allocation6], %s1597_s17, %s1597_s17, %s1598_s18  }
   0x9   :  { %1590 = dma.done.wait [#allocation3], 512  }
   0xa   :  { %1591 = vsyncadd [#allocation3], 4294966784 }
   0xb   :  { %1592 = dma.done.wait [#allocation6], 512  }
   0xc   :  { %1593 = vsyncadd [#allocation6], 4294966784  ;;  %vm105_vm0 = vcmask 1043456   ;;  %v167_v0 = vld [vmem:[%s1899_s2 + $0x18] sm:$0xff]  ;;  %v166_v1 = vld [vmem:[%s1899_s2 + $0x10] sm:$0xff]  ;;  %vm70_vm1 = vcmask 1041409  }
   0xd   :  { %v112_v2 = vld [vmem:[%s1898_s1] sm:$0xf]  ;;  %184 = vmatpush.msra.mxu1 %v167_v0  ;;  %v1678_v4 = vld [vmem:[%s1897_s0 + $0x8] sm:$0xff]  ;;  %vm75_vm2 = vcmask 1043459   ;;  %vm80_vm3 = vcmask 1045509   ;;  %vm85_vm4 = vcmask 1047559   ;;  %249 = vmatpush.msra.mxu2 %v167_v0 }
   0xe   :  { %1343 = vmatpush.msk.msra.mxu0 %vm105_vm0, %v112_v2  ;;  %v1673_v3 = vld [vmem:[%s1897_s0] sm:$0xff]  ;;  %vm103_vm5 = vcmask 1041408   ;;  %v165_v5 = vld [vmem:[%s1899_s2 + $0x8] sm:$0xff]  ;;  %v69_v6 = vrot.slane %v1678_v4, 7  ;;  %v74_v8 = vrot.slane %v1678_v4, 6  ;;  %314 = vmatpush.msra.mxu3 %v167_v0  ;;  %v79_v10 = vrot.slane %v1678_v4, 5 }
   0xf   :  { %v73_v7 = vrot.slane %v1673_v3, 7  ;;  %v78_v9 = vrot.slane %v1673_v3, 6  ;;  %185 = vmatpush.msra.mxu1 %v166_v1  ;;  %v83_v11 = vrot.slane %v1673_v3, 5  ;;  %v84_v12 = vrot.slane %v1678_v4, 4  ;;  %v164_v15 = vld [vmem:[%s1899_s2] sm:$0xff]  ;;  %250 = vmatpush.msra.mxu2 %v166_v1  ;;  %s1601_s11 = smov 64  }
  0x10   :  { %vm107_vm6 = vcmask 1045504   ;;  %574 = vmatpush.msrb.mxu0 %v167_v0  ;;  %v71_v13 = vsel %vm70_vm1, %v69_v6, %v1673_v3  ;;  %vm117_vm7 = vcmask 31744   ;;  %315 = vmatpush.msra.mxu3 %v166_v1  ;;  %v1600_v21 = vmov 0.0   ;;  %v1706_v22 = vld [vmem:[%s1900_s3] ss:$0 sm:$0xff]  ;;  %s1602_s3 = smov 32  }
  0x11   :  { %v76_v14 = vsel %vm75_vm2, %v74_v8, %v73_v7  ;;  %186 = vmatpush.msra.mxu1 %v165_v5  ;;  %v81_v16 = vsel %vm80_vm3, %v79_v10, %v78_v9  ;;  %v86_v17 = vsel %vm85_vm4, %v84_v12, %v83_v11  ;;  %251 = vmatpush.msra.mxu2 %v165_v5  ;;  %vm168_vm12 = vcmask 261120   ;;  %s1603_s22 = smov [#allocation7]  }
  0x12   :  { %v104_v18 = vsel %vm103_vm5, %v71_v13, %v76_v14  ;;  %575 = vmatpush.msrb.mxu0 %v166_v1  ;;  %316 = vmatpush.msra.mxu3 %v165_v5  ;;  %s1330_s23 = sshll.u32 %s1603_s22, 4  ;;  %s1331_s23 = int_to_ptr.vmem [resolvable:$true] %s1330_s23 }
  0x13   :  { %v106_v19 = vsel %vm105_vm0, %v104_v18, %v81_v16  ;;  %187 = vmatpush.msra.mxu1 %v164_v15  ;;  %252 = vmatpush.msra.mxu2 %v164_v15 }
  0x14   :  { %v108_v20 = vsel %vm107_vm6, %v106_v19, %v86_v17  ;;  %576 = vmatpush.msrb.mxu0 %v165_v5  ;;  %188 = vmatmul.f32.vlgmr.msra.gmra.mxu1 %v1600_v21 }
  0x15   :  { %1344 = vmatmul.msk.f32.vlgmr.msra.gmra.mxu0 %vm117_vm7, %v108_v20  ;;  %317 = vmatpush.msra.mxu3 %v164_v15 }
  0x16   :  { %379 = vmatpush.msrb.mxu1 %v167_v0  ;;  %444 = vmatpush.msrb.mxu2 %v167_v0 }
  0x17   :  { %509 = vmatpush.msrb.mxu3 %v167_v0  ;;  %577 = vmatpush.msrb.mxu0 %v164_v15 }
  0x18   :  { %380 = vmatpush.msrb.mxu1 %v166_v1  ;;  %445 = vmatpush.msrb.mxu2 %v166_v1 }
  0x19   :  { %510 = vmatpush.msrb.mxu3 %v166_v1 }
  0x1a   :  { %381 = vmatpush.msrb.mxu1 %v165_v5  ;;  %446 = vmatpush.msrb.mxu2 %v165_v5 }
  0x1b   :  { %511 = vmatpush.msrb.mxu3 %v165_v5 }
  0x1c   :  { %382 = vmatpush.msrb.mxu1 %v164_v15  ;;  %447 = vmatpush.msrb.mxu2 %v164_v15 }
  0x1d   :  { %512 = vmatpush.msrb.mxu3 %v164_v15 }
  0x1e   :  { %639 = vmatpush.msra.mxu1 %v167_v0 }
  0x20   :  { %640 = vmatpush.msra.mxu1 %v166_v1 }
  0x22   :  { %641 = vmatpush.msra.mxu1 %v165_v5 }
  0x24   :  { %642 = vmatpush.msra.mxu1 %v164_v15 }
  0x91   :  { %v189_v24 = vpop.f32.mrf.mxu1 }
  0x92   :  { %v144_v23 = vpop.f32.mrf.mxu0 }
  0x93   :  { %v1709_v25 = vadd.f32 %v1706_v22, %v144_v23 }
  0x95   :  { %v192_v26 = vadd.f32 %v189_v24, %v1709_v25  ;;  %v152_v51 = vrot.slane %v1709_v25, 2  ;;  %v153_v16 = vrot.slane %v1709_v25, 4 }
  0x97   :  { %1390 = vtanh.f32 %v192_v26  ;;  %v1346_v28 = vmul.f32 -1.442695, %v192_v26 }
  0x99   :  { %1392 = vpow2.f32 %v1346_v28 }
  0x9d   :  { %v1391_v27 = vpop.eup %1390 }
  0x9e   :  { %215 = vrot.lane.b32.xlu0 %v1391_v27, %s1601_s11 }
  0x9f   :  { %v1393_v29 = vpop.eup %1392 }
  0xa0   :  { %v196_v30 = vadd.f32 1.0, %v1393_v29 }
  0xa2   :  { %1394 = vrcp.f32 %v196_v30  ;;  %v208_v36 = vand.u32 2147483648, %v196_v30  ;;  %vm202_vm9 = vweird.f32 %v196_v30  ;;  %v206_v37 = vand.u32 2147483647, %v196_v30 }
  0xa4   :  { %v209_v39 = vor.u32 1.1754944e-38, %v208_v36  ;;  %vm207_vm11 = vcmp.eq.f32.partialorder %v206_v37, 8.507059e+37 }
  0xa8   :  { %v1395_v31 = vpop.eup %1394 }
  0xa9   :  { %v198_v32 = vmul.f32 %v1395_v31, %v196_v30  ;;  %vm203_vm8 = vweird.f32 %v1395_v31 }
  0xaa   :  { %vm204_vm10 = vmor %vm202_vm9, %vm203_vm8 }
  0xab   :  { %v199_v33 = vsub.f32 1.0, %v198_v32 }
  0xad   :  { %v200_v34 = vmul.f32 %v1395_v31, %v199_v33 }
  0xaf   :  { %v201_v35 = vadd.f32 %v1395_v31, %v200_v34 }
  0xb1   :  { %v205_v38 = vsel %vm204_vm10, %v1395_v31, %v201_v35 }
  0xb2   :  { %v210_v41 = vsel %vm207_vm11, %v209_v39, %v205_v38 }
  0xb3   :  { %v213_v43 = vmul.f32 0.0, %v210_v41 }
 0x110   :  { %v216_v40 = vpop.permute.xlu0 %215 }
 0x111   :  { %v218_v42 = vmul.f32 %v216_v40, %v210_v41 }
 0x113   :  { %220 = vrot.lane.b32.xlu0 %v218_v42, %s1602_s3 }
 0x185   :  { %v221_v44 = vpop.permute.xlu0 %220 }
 0x186   :  { %v223_v45 = vadd.f32 %v221_v44, %v213_v43 }
 0x188   :  { %1396 = vtanh.f32 %v223_v45 }
 0x18e   :  { %v1397_v46 = vpop.eup %1396 }
 0x18f   :  { %226 = vrot.lane.b32.xlu1 %v1397_v46, %s1601_s11  ;;  %v154_v46 = vrot.slane %v1709_v25, 6 }
 0x201   :  { %v227_v47 = vpop.permute.xlu1 %226 }
 0x202   :  { %v1715_v48 = vmul.f32 %v227_v47, %v210_v41 }
 0x204   :  { %231 = vst [vmem:[#allocation1] ss:$4 sm:$0xff] %v1715_v48 }
 0x20b   :  { %v232_v49 = vld.sshfl [vmem:[#allocation1] sm:$0xff pattern:$0x73625140] }
 0x20c   :  { %233 = vrot.lane.b32.xlu1 %v232_v49, %s1602_s3 }
 0x27e   :  { %v234_v50 = vpop.permute.xlu1 %233 }
 0x27f   :  { %1347 = vmatmul.msk.f32.vlgmr.msra.gmra.mxu2 %vm168_vm12, %v234_v50 }
 0x302   :  { %v254_v52 = vpop.f32.mrf.mxu2 }
 0x303   :  { %v257_v53 = vadd.f32 %v254_v52, %v152_v51 }
 0x305   :  { %1398 = vtanh.f32 %v257_v53  ;;  %v1348_v55 = vmul.f32 -1.442695, %v257_v53 }
 0x307   :  { %1400 = vpow2.f32 %v1348_v55 }
 0x30b   :  { %v1399_v54 = vpop.eup %1398 }
 0x30c   :  { %280 = vrot.lane.b32.xlu2 %v1399_v54, %s1601_s11 }
 0x30d   :  { %v1401_v56 = vpop.eup %1400 }
 0x30e   :  { %v261_v57 = vadd.f32 1.0, %v1401_v56 }
 0x310   :  { %1402 = vrcp.f32 %v261_v57  ;;  %v273_v63 = vand.u32 2147483648, %v261_v57  ;;  %vm267_vm14 = vweird.f32 %v261_v57  ;;  %v271_v0 = vand.u32 2147483647, %v261_v57 }
 0x312   :  { %v274_v2 = vor.u32 1.1754944e-38, %v273_v63  ;;  %vm272_vm8 = vcmp.eq.f32.partialorder %v271_v0, 8.507059e+37 }
 0x316   :  { %v1403_v58 = vpop.eup %1402 }
 0x317   :  { %v263_v59 = vmul.f32 %v1403_v58, %v261_v57  ;;  %vm268_vm13 = vweird.f32 %v1403_v58 }
 0x318   :  { %vm269_vm15 = vmor %vm267_vm14, %vm268_vm13 }
 0x319   :  { %v264_v60 = vsub.f32 1.0, %v263_v59 }
 0x31b   :  { %v265_v61 = vmul.f32 %v1403_v58, %v264_v60 }
 0x31d   :  { %v266_v62 = vadd.f32 %v1403_v58, %v265_v61 }
 0x31f   :  { %v270_v1 = vsel %vm269_vm15, %v1403_v58, %v266_v62 }
 0x320   :  { %v275_v6 = vsel %vm272_vm8, %v274_v2, %v270_v1 }
 0x321   :  { %v278_v8 = vmul.f32 %v275_v6, %v223_v45 }
 0x366   :  { %v281_v5 = vpop.permute.xlu2 %280 }
 0x367   :  { %v283_v7 = vmul.f32 %v281_v5, %v275_v6 }
 0x369   :  { %285 = vrot.lane.b32.xlu2 %v283_v7, %s1602_s3 }
 0x3c3   :  { %v286_v9 = vpop.permute.xlu2 %285 }
 0x3c4   :  { %v288_v10 = vadd.f32 %v286_v9, %v278_v8 }
 0x3c6   :  { %1404 = vtanh.f32 %v288_v10 }
 0x3cc   :  { %v1405_v11 = vpop.eup %1404 }
 0x3cd   :  { %291 = vrot.lane.b32.xlu0 %v1405_v11, %s1601_s11  ;;  %v89_v11 = vrot.slane %v1678_v4, 3 }
 0x43f   :  { %v292_v12 = vpop.permute.xlu0 %291 }
 0x440   :  { %v1724_v13 = vmul.f32 %v292_v12, %v275_v6  ;;  %v92_v12 = vrot.slane %v1673_v3, 3 }
 0x442   :  { %296 = vst [vmem:[#allocation1] ss:$4 sm:$0xff] %v1724_v13 }
 0x449   :  { %v297_v14 = vld.sshfl [vmem:[#allocation1] sm:$0xff pattern:$0x73625140] }
 0x44a   :  { %298 = vrot.lane.b32.xlu1 %v297_v14, %s1602_s3  ;;  %v93_v14 = vrot.slane %v1678_v4, 2 }
 0x4bc   :  { %v299_v15 = vpop.permute.xlu1 %298 }
 0x4bd   :  { %1349 = vmatmul.msk.f32.vlgmr.msra.gmra.mxu3 %vm168_vm12, %v299_v15  ;;  %v96_v15 = vrot.slane %v1673_v3, 2 }
 0x540   :  { %v319_v17 = vpop.f32.mrf.mxu3 }
 0x541   :  { %v322_v18 = vadd.f32 %v319_v17, %v153_v16  ;;  %v97_v16 = vrot.slane %v1678_v4, 1 }
 0x543   :  { %1406 = vtanh.f32 %v322_v18  ;;  %v1350_v20 = vmul.f32 -1.442695, %v322_v18  ;;  %v94_v18 = vsel %vm75_vm2, %v93_v14, %v92_v12 }
 0x545   :  { %1408 = vpow2.f32 %v1350_v20  ;;  %v98_v20 = vsel %vm80_vm3, %v97_v16, %v96_v15 }
 0x549   :  { %v1407_v19 = vpop.eup %1406 }
 0x54a   :  { %345 = vrot.lane.b32.xlu2 %v1407_v19, %s1601_s11  ;;  %v100_v19 = vrot.slane %v1673_v3, 1 }
 0x54b   :  { %v1409_v23 = vpop.eup %1408 }
 0x54c   :  { %v326_v24 = vadd.f32 1.0, %v1409_v23 }
 0x54e   :  { %1410 = vrcp.f32 %v326_v24  ;;  %v338_v31 = vand.u32 2147483648, %v326_v24  ;;  %vm332_vm10 = vweird.f32 %v326_v24  ;;  %v336_v32 = vand.u32 2147483647, %v326_v24 }
 0x550   :  { %v339_v34 = vor.u32 1.1754944e-38, %v338_v31  ;;  %vm337_vm13 = vcmp.eq.f32.partialorder %v336_v32, 8.507059e+37 }
 0x554   :  { %v1411_v26 = vpop.eup %1410 }
 0x555   :  { %v328_v27 = vmul.f32 %v1411_v26, %v326_v24  ;;  %vm333_vm9 = vweird.f32 %v1411_v26  ;;  %v101_v24 = vsel %vm85_vm4, %v1678_v4, %v100_v19 }
 0x556   :  { %vm334_vm11 = vmor %vm332_vm10, %vm333_vm9 }
 0x557   :  { %v329_v28 = vsub.f32 1.0, %v328_v27 }
 0x559   :  { %v330_v29 = vmul.f32 %v1411_v26, %v329_v28 }
 0x55b   :  { %v331_v30 = vadd.f32 %v1411_v26, %v330_v29 }
 0x55d   :  { %v335_v33 = vsel %vm334_vm11, %v1411_v26, %v331_v30 }
 0x55e   :  { %v340_v36 = vsel %vm337_vm13, %v339_v34, %v335_v33 }
 0x55f   :  { %v343_v38 = vmul.f32 %v340_v36, %v288_v10  ;;  %v88_v10 = vrot.slane %v1673_v3, 4 }
 0x561   :  { %v90_v17 = vsel %vm70_vm1, %v89_v11, %v88_v10 }
 0x562   :  { %v109_v23 = vsel %vm103_vm5, %v90_v17, %v94_v18 }
 0x563   :  { %v110_v26 = vsel %vm105_vm0, %v109_v23, %v98_v20 }
 0x564   :  { %v111_v27 = vsel %vm107_vm6, %v110_v26, %v101_v24 }
 0x565   :  { %1345 = vmatmul.msk.f32.gmra.mxu0 %vm117_vm7, %v111_v27 }
 0x5a4   :  { %v346_v35 = vpop.permute.xlu2 %345 }
 0x5a5   :  { %v348_v37 = vmul.f32 %v346_v35, %v340_v36 }
 0x5a7   :  { %350 = vrot.lane.b32.xlu0 %v348_v37, %s1602_s3 }
 0x5e2   :  { %v147_v29 = vpop.f32.mrf.mxu0 }
 0x5e3   :  { %v1764_v30 = vadd.f32 %v1706_v22, %v147_v29 }
 0x5e5   :  { %v156_v24 = vrot.slane %v1764_v30, 4 }
 0x619   :  { %v351_v39 = vpop.permute.xlu0 %350 }
 0x61a   :  { %v353_v40 = vadd.f32 %v351_v39, %v343_v38 }
 0x61c   :  { %1412 = vtanh.f32 %v353_v40 }
 0x622   :  { %v1413_v41 = vpop.eup %1412 }
 0x623   :  { %356 = vrot.lane.b32.xlu1 %v1413_v41, %s1601_s11 }
 0x695   :  { %v357_v42 = vpop.permute.xlu1 %356 }
 0x696   :  { %v1733_v43 = vmul.f32 %v357_v42, %v340_v36 }
 0x698   :  { %361 = vst [vmem:[#allocation1] ss:$4 sm:$0xff] %v1733_v43 }
 0x69f   :  { %v362_v44 = vld.sshfl [vmem:[#allocation1] sm:$0xff pattern:$0x73625140] }
 0x6a0   :  { %363 = vrot.lane.b32.xlu2 %v362_v44, %s1602_s3 }
 0x6fa   :  { %v364_v45 = vpop.permute.xlu2 %363 }
 0x6fb   :  { %1351 = vmatmul.msk.f32.vlgmr.msrb.gmra.mxu1 %vm168_vm12, %v364_v45 }
 0x778   :  { %v384_v47 = vpop.f32.mrf.mxu1 }
 0x779   :  { %v387_v49 = vadd.f32 %v384_v47, %v154_v46 }
 0x77b   :  { %1414 = vtanh.f32 %v387_v49  ;;  %v1352_v51 = vmul.f32 -1.442695, %v387_v49 }
 0x77d   :  { %1416 = vpow2.f32 %v1352_v51 }
 0x781   :  { %v1415_v50 = vpop.eup %1414 }
 0x782   :  { %410 = vrot.lane.b32.xlu0 %v1415_v50, %s1601_s11 }
 0x783   :  { %v1417_v52 = vpop.eup %1416 }
 0x784   :  { %v391_v53 = vadd.f32 1.0, %v1417_v52 }
 0x786   :  { %1418 = vrcp.f32 %v391_v53  ;;  %v403_v59 = vand.u32 2147483648, %v391_v53  ;;  %vm397_vm15 = vweird.f32 %v391_v53  ;;  %v401_v25 = vand.u32 2147483647, %v391_v53 }
 0x788   :  { %v404_v61 = vor.u32 1.1754944e-38, %v403_v59  ;;  %vm402_vm9 = vcmp.eq.f32.partialorder %v401_v25, 8.507059e+37 }
 0x78c   :  { %v1419_v54 = vpop.eup %1418 }
 0x78d   :  { %v393_v55 = vmul.f32 %v1419_v54, %v391_v53  ;;  %vm398_vm14 = vweird.f32 %v1419_v54 }
 0x78e   :  { %vm399_vm8 = vmor %vm397_vm15, %vm398_vm14 }
 0x78f   :  { %v394_v56 = vsub.f32 1.0, %v393_v55 }
 0x791   :  { %v395_v57 = vmul.f32 %v1419_v54, %v394_v56  ;;  %v155_v56 = vrot.slane %v1764_v30, 2 }
 0x793   :  { %v396_v58 = vadd.f32 %v1419_v54, %v395_v57 }
 0x795   :  { %v400_v60 = vsel %vm399_vm8, %v1419_v54, %v396_v58 }
 0x796   :  { %v405_v63 = vsel %vm402_vm9, %v404_v61, %v400_v60 }
 0x797   :  { %v408_v1 = vmul.f32 %v405_v63, %v353_v40 }
 0x7f4   :  { %v411_v62 = vpop.permute.xlu0 %410 }
 0x7f5   :  { %v413_v0 = vmul.f32 %v411_v62, %v405_v63 }
 0x7f7   :  { %415 = vrot.lane.b32.xlu1 %v413_v0, %s1602_s3 }
 0x869   :  { %v416_v2 = vpop.permute.xlu1 %415 }
 0x86a   :  { %v418_v5 = vadd.f32 %v416_v2, %v408_v1 }
 0x86c   :  { %1420 = vtanh.f32 %v418_v5 }
 0x872   :  { %v1421_v6 = vpop.eup %1420 }
 0x873   :  { %421 = vrot.lane.b32.xlu2 %v1421_v6, %s1601_s11 }
 0x8cd   :  { %v422_v7 = vpop.permute.xlu2 %421 }
 0x8ce   :  { %v1742_v8 = vmul.f32 %v422_v7, %v405_v63 }
 0x8d0   :  { %426 = vst [vmem:[#allocation1] ss:$4 sm:$0xff] %v1742_v8 }
 0x8d7   :  { %v427_v9 = vld.sshfl [vmem:[#allocation1] sm:$0xff pattern:$0x73625140] }
 0x8d8   :  { %428 = vrot.lane.b32.xlu0 %v427_v9, %s1602_s3 }
 0x94a   :  { %v429_v28 = vpop.permute.xlu0 %428 }
 0x94b   :  { %1353 = vmatmul.msk.f32.vlgmr.msrb.gmra.mxu2 %vm168_vm12, %v429_v28 }
 0x9ce   :  { %v449_v3 = vpop.f32.mrf.mxu2 }
 0x9cf   :  { %v452_v31 = vadd.f32 %v449_v3, %v1764_v30 }
 0x9d1   :  { %1422 = vtanh.f32 %v452_v31  ;;  %v1354_v4 = vmul.f32 -1.442695, %v452_v31 }
 0x9d3   :  { %1424 = vpow2.f32 %v1354_v4 }
 0x9d7   :  { %v1423_v32 = vpop.eup %1422 }
 0x9d8   :  { %475 = vrot.lane.b32.xlu1 %v1423_v32, %s1601_s11 }
 0x9d9   :  { %v1425_v33 = vpop.eup %1424 }
 0x9da   :  { %v456_v34 = vadd.f32 1.0, %v1425_v33 }
 0x9dc   :  { %1426 = vrcp.f32 %v456_v34  ;;  %v468_v22 = vand.u32 2147483648, %v456_v34  ;;  %vm462_vm2 = vweird.f32 %v456_v34  ;;  %v466_v40 = vand.u32 2147483647, %v456_v34 }
 0x9de   :  { %v469_v42 = vor.u32 1.1754944e-38, %v468_v22  ;;  %vm467_vm4 = vcmp.eq.f32.partialorder %v466_v40, 8.507059e+37 }
 0x9e2   :  { %v1427_v35 = vpop.eup %1426 }
 0x9e3   :  { %v458_v36 = vmul.f32 %v1427_v35, %v456_v34  ;;  %vm463_vm1 = vweird.f32 %v1427_v35 }
 0x9e4   :  { %vm464_vm3 = vmor %vm462_vm2, %vm463_vm1 }
 0x9e5   :  { %v459_v37 = vsub.f32 1.0, %v458_v36 }
 0x9e7   :  { %v460_v38 = vmul.f32 %v1427_v35, %v459_v37 }
 0x9e9   :  { %v461_v39 = vadd.f32 %v1427_v35, %v460_v38 }
 0x9eb   :  { %v465_v41 = vsel %vm464_vm3, %v1427_v35, %v461_v39 }
 0x9ec   :  { %v470_v45 = vsel %vm467_vm4, %v469_v42, %v465_v41 }
 0x9ed   :  { %v473_v47 = vmul.f32 %v470_v45, %v418_v5 }
 0xa4a   :  { %v476_v44 = vpop.permute.xlu1 %475 }
 0xa4b   :  { %v478_v46 = vmul.f32 %v476_v44, %v470_v45 }
 0xa4d   :  { %480 = vrot.lane.b32.xlu2 %v478_v46, %s1602_s3 }
 0xaa7   :  { %v481_v49 = vpop.permute.xlu2 %480 }
 0xaa8   :  { %v483_v50 = vadd.f32 %v481_v49, %v473_v47 }
 0xaaa   :  { %1428 = vtanh.f32 %v483_v50 }
 0xab0   :  { %v1429_v51 = vpop.eup %1428 }
 0xab1   :  { %486 = vrot.lane.b32.xlu0 %v1429_v51, %s1601_s11 }
 0xb23   :  { %v487_v52 = vpop.permute.xlu0 %486 }
 0xb24   :  { %v1770_v53 = vmul.f32 %v487_v52, %v470_v45 }
 0xb26   :  { %491 = vst [vmem:[#allocation1] ss:$4 sm:$0xff] %v1770_v53 }
 0xb2d   :  { %v492_v54 = vld.sshfl [vmem:[#allocation1] sm:$0xff pattern:$0x73625140] }
 0xb2e   :  { %493 = vrot.lane.b32.xlu1 %v492_v54, %s1602_s3 }
 0xba0   :  { %v494_v55 = vpop.permute.xlu1 %493 }
 0xba1   :  { %1355 = vmatmul.msk.f32.vlgmr.msrb.gmra.mxu3 %vm168_vm12, %v494_v55 }
 0xc24   :  { %v514_v57 = vpop.f32.mrf.mxu3 }
 0xc25   :  { %v517_v58 = vadd.f32 %v514_v57, %v155_v56 }
 0xc27   :  { %1430 = vtanh.f32 %v517_v58  ;;  %v1356_v25 = vmul.f32 -1.442695, %v517_v58 }
 0xc29   :  { %1432 = vpow2.f32 %v1356_v25  ;;  %v717_v25 = vld [vmem:[#allocation2 + $0x8] sm:$0xff] }
 0xc2d   :  { %v1431_v59 = vpop.eup %1430 }
 0xc2e   :  { %540 = vrot.lane.b32.xlu2 %v1431_v59, %s1601_s11  ;;  %v718_v59 = vld [vmem:[#allocation2 + $0x10] sm:$0xff] }
 0xc2f   :  { %v1433_v60 = vpop.eup %1432 }
 0xc30   :  { %v521_v61 = vadd.f32 1.0, %v1433_v60  ;;  %v772_v60 = vld [vmem:[#allocation5 + $0x8] sm:$0xff] }
 0xc32   :  { %1434 = vrcp.f32 %v521_v61  ;;  %v533_v5 = vand.u32 2147483648, %v521_v61  ;;  %vm527_vm10 = vweird.f32 %v521_v61  ;;  %v531_v6 = vand.u32 2147483647, %v521_v61 }
 0xc34   :  { %v534_v9 = vor.u32 1.1754944e-38, %v533_v5  ;;  %vm532_vm13 = vcmp.eq.f32.partialorder %v531_v6, 8.507059e+37  ;;  %v1807_v5 = vld [vmem:[%s1903_s6] ss:$0 sm:$0xff] }
 0xc38   :  { %v1435_v62 = vpop.eup %1434 }
 0xc39   :  { %v523_v63 = vmul.f32 %v1435_v62, %v521_v61  ;;  %vm528_vm7 = vweird.f32 %v1435_v62  ;;  %v771_v61 = vld [vmem:[#allocation5] sm:$0xff] }
 0xc3a   :  { %vm529_vm11 = vmor %vm527_vm10, %vm528_vm7 }
 0xc3b   :  { %v524_v0 = vsub.f32 1.0, %v523_v63  ;;  %v157_v63 = vrot.slane %v1764_v30, 6 }
 0xc3d   :  { %v525_v1 = vmul.f32 %v1435_v62, %v524_v0 }
 0xc3f   :  { %v526_v2 = vadd.f32 %v1435_v62, %v525_v1 }
 0xc41   :  { %v530_v7 = vsel %vm529_vm11, %v1435_v62, %v526_v2 }
 0xc42   :  { %v535_v11 = vsel %vm532_vm13, %v534_v9, %v530_v7 }
 0xc43   :  { %v538_v14 = vmul.f32 %v535_v11, %v483_v50 }
 0xc88   :  { %v541_v10 = vpop.permute.xlu2 %540 }
 0xc89   :  { %v543_v12 = vmul.f32 %v541_v10, %v535_v11 }
 0xc8b   :  { %545 = vrot.lane.b32.xlu0 %v543_v12, %s1602_s3 }
 0xcfd   :  { %v546_v15 = vpop.permute.xlu0 %545 }
 0xcfe   :  { %v548_v16 = vadd.f32 %v546_v15, %v538_v14 }
 0xd00   :  { %1436 = vtanh.f32 %v548_v16 }
 0xd06   :  { %v1437_v17 = vpop.eup %1436 }
 0xd07   :  { %551 = vrot.lane.b32.xlu1 %v1437_v17, %s1601_s11 }
 0xd79   :  { %v552_v18 = vpop.permute.xlu1 %551 }
 0xd7a   :  { %v554_v19 = vmul.f32 %v552_v18, %v535_v11 }
 0xd7c   :  { %556 = vst [vmem:[#allocation1] ss:$4 sm:$0xff] %v554_v19 }
 0xd83   :  { %v557_v20 = vld.sshfl [vmem:[#allocation1] sm:$0xff pattern:$0x73625140] }
 0xd84   :  { %558 = vrot.lane.b32.xlu2 %v557_v20, %s1602_s3 }
 0xdde   :  { %v559_v23 = vpop.permute.xlu2 %558 }
 0xddf   :  { %1357 = vmatmul.msk.f32.vlgmr.msrb.gmra.mxu0 %vm168_vm12, %v559_v23 }
 0xe5c   :  { %v579_v26 = vpop.f32.mrf.mxu0 }
 0xe5d   :  { %v582_v27 = vadd.f32 %v579_v26, %v156_v24 }
 0xe5f   :  { %1438 = vtanh.f32 %v582_v27  ;;  %v1358_v29 = vmul.f32 -1.442695, %v582_v27 }
 0xe61   :  { %1440 = vpow2.f32 %v1358_v29 }
 0xe65   :  { %v1439_v28 = vpop.eup %1438 }
 0xe66   :  { %605 = vrot.lane.b32.xlu0 %v1439_v28, %s1601_s11 }
 0xe67   :  { %v1441_v3 = vpop.eup %1440 }
 0xe68   :  { %v586_v31 = vadd.f32 1.0, %v1441_v3 }
 0xe6a   :  { %1442 = vrcp.f32 %v586_v31  ;;  %v598_v36 = vand.u32 2147483648, %v586_v31  ;;  %vm592_vm15 = vweird.f32 %v586_v31  ;;  %v596_v37 = vand.u32 2147483647, %v586_v31 }
 0xe6c   :  { %v599_v39 = vor.u32 1.1754944e-38, %v598_v36  ;;  %vm597_vm9 = vcmp.eq.f32.partialorder %v596_v37, 8.507059e+37 }
 0xe70   :  { %v1443_v32 = vpop.eup %1442 }
 0xe71   :  { %v588_v4 = vmul.f32 %v1443_v32, %v586_v31  ;;  %vm593_vm14 = vweird.f32 %v1443_v32 }
 0xe72   :  { %vm594_vm8 = vmor %vm592_vm15, %vm593_vm14 }
 0xe73   :  { %v589_v33 = vsub.f32 1.0, %v588_v4 }
 0xe75   :  { %v590_v34 = vmul.f32 %v1443_v32, %v589_v33 }
 0xe77   :  { %v591_v35 = vadd.f32 %v1443_v32, %v590_v34 }
 0xe79   :  { %v595_v38 = vsel %vm594_vm8, %v1443_v32, %v591_v35 }
 0xe7a   :  { %v600_v40 = vsel %vm597_vm9, %v599_v39, %v595_v38 }
 0xe7b   :  { %v603_v42 = vmul.f32 %v600_v40, %v548_v16 }
 0xed8   :  { %v606_v22 = vpop.permute.xlu0 %605 }
 0xed9   :  { %v608_v41 = vmul.f32 %v606_v22, %v600_v40 }
 0xedb   :  { %610 = vrot.lane.b32.xlu1 %v608_v41, %s1602_s3 }
 0xf4d   :  { %v611_v44 = vpop.permute.xlu1 %610 }
 0xf4e   :  { %v1784_v45 = vadd.f32 %v611_v44, %v603_v42 }
 0xf50   :  { %1444 = vtanh.f32 %v1784_v45 }
 0xf56   :  { %v1445_v46 = vpop.eup %1444 }
 0xf57   :  { %616 = vrot.lane.b32.xlu2 %v1445_v46, %s1601_s11 }
 0xfb1   :  { %v617_v47 = vpop.permute.xlu2 %616 }
 0xfb2   :  { %v619_v49 = vmul.f32 %v617_v47, %v600_v40 }
 0xfb4   :  { %621 = vst [vmem:[#allocation1] ss:$4 sm:$0xff] %v619_v49 }
 0xfbb   :  { %v622_v50 = vld.sshfl [vmem:[#allocation1] sm:$0xff pattern:$0x73625140] }
 0xfbc   :  { %623 = vrot.lane.b32.xlu0 %v622_v50, %s1602_s3  ;;  %686 = vst [vmem:[#allocation1 + $0x1] ss:$4 sm:$0xff] %v1724_v13  ;;  %v719_v13 = vld [vmem:[#allocation2 + $0x18] sm:$0xff] }
 0xfbd   :  { %746 = vmatpush.msra.mxu2 %v719_v13 }
 0xfbf   :  { %747 = vmatpush.msra.mxu2 %v718_v59 }
 0xfc1   :  { %748 = vmatpush.msra.mxu2 %v717_v25 }
 0xfc3   :  { %v687_v51 = vld.sshfl [vmem:[#allocation1] sm:$0xff pattern:$0x73625140] }
 0xfc4   :  { %690 = vst [vmem:[#allocation1 + $0x2] ss:$4 sm:$0xff] %v1733_v43  ;;  %v710_v54 = vsel %vm103_vm5, %v1715_v48, %v687_v51  ;;  %v774_v43 = vld [vmem:[#allocation5 + $0x18] sm:$0xff]  ;;  %v716_v48 = vld [vmem:[#allocation2] sm:$0xff] }
 0xfc5   :  { %787 = vmatpush.msra.mxu3 %v774_v43  ;;  %852 = vmatpush.msra.mxu0 %v774_v43 }
 0xfc6   :  { %917 = vmatpush.msrb.mxu1 %v774_v43  ;;  %749 = vmatpush.msra.mxu2 %v716_v48 }
 0xfc8   :  { %1177 = vmatpush.msrb.mxu2 %v774_v43 }
 0xfcb   :  { %v691_v52 = vld.sshfl [vmem:[#allocation1] sm:$0xff pattern:$0x73625140] }
 0xfcc   :  { %694 = vst [vmem:[#allocation1 + $0x3] ss:$4 sm:$0xff] %v1742_v8  ;;  %v711_v56 = vsel %vm105_vm0, %v710_v54, %v691_v52  ;;  %v773_v8 = vld [vmem:[#allocation5 + $0x10] sm:$0xff] }
 0xfcd   :  { %788 = vmatpush.msra.mxu3 %v773_v8  ;;  %853 = vmatpush.msra.mxu0 %v773_v8 }
 0xfce   :  { %918 = vmatpush.msrb.mxu1 %v773_v8  ;;  %1178 = vmatpush.msrb.mxu2 %v773_v8 }
 0xfcf   :  { %789 = vmatpush.msra.mxu3 %v772_v60  ;;  %854 = vmatpush.msra.mxu0 %v772_v60 }
 0xfd0   :  { %919 = vmatpush.msrb.mxu1 %v772_v60  ;;  %1179 = vmatpush.msrb.mxu2 %v772_v60 }
 0xfd1   :  { %790 = vmatpush.msra.mxu3 %v771_v61  ;;  %855 = vmatpush.msra.mxu0 %v771_v61 }
 0xfd2   :  { %791 = vmatmul.f32.vlgmr.msra.gmra.mxu3 %v1600_v21  ;;  %920 = vmatpush.msrb.mxu1 %v771_v61 }
 0xfd3   :  { %v695_v55 = vld.sshfl [vmem:[#allocation1] sm:$0xff pattern:$0x73625140]  ;;  %982 = vmatpush.msrb.mxu3 %v774_v43  ;;  %1047 = vmatpush.msrb.mxu0 %v774_v43 }
 0xfd4   :  { %v712_v57 = vsel %vm107_vm6, %v711_v56, %v695_v55  ;;  %698 = vst [vmem:[#allocation1 + $0x1] ss:$4 sm:$0xff] %v554_v19  ;;  %1180 = vmatpush.msrb.mxu2 %v771_v61 }
 0xfd5   :  { %726 = vrot.lane.b32.xlu1 %v712_v57, %s1602_s3  ;;  %983 = vmatpush.msrb.mxu3 %v773_v8 }
 0xfd6   :  { %1048 = vmatpush.msrb.mxu0 %v773_v8 }
 0xfd7   :  { %984 = vmatpush.msrb.mxu3 %v772_v60 }
 0xfd8   :  { %1049 = vmatpush.msrb.mxu0 %v772_v60 }
 0xfd9   :  { %985 = vmatpush.msrb.mxu3 %v771_v61 }
 0xfda   :  { %1050 = vmatpush.msrb.mxu0 %v771_v61 }
 0xfdb   :  { %v1797_v58 = vld.sshfl [vmem:[#allocation1] sm:$0xff pattern:$0x73625140]  ;;  %1242 = vmatpush.msra.mxu3 %v774_v43 }
 0xfdc   :  { %702 = vst [vmem:[#allocation1 + $0x2] ss:$4 sm:$0xff] %v619_v49 }
 0xfdd   :  { %1243 = vmatpush.msra.mxu3 %v773_v8 }
 0xfdf   :  { %1244 = vmatpush.msra.mxu3 %v772_v60 }
 0xfe1   :  { %1245 = vmatpush.msra.mxu3 %v771_v61 }
 0xfe3   :  { %v1819_v57 = vld.sshfl [vmem:[#allocation1] sm:$0xff pattern:$0x73625140] }
0x102e   :  { %v624_v62 = vpop.permute.xlu0 %623 }
0x102f   :  { %1359 = vmatmul.msk.f32.vlgmr.msra.gmra.mxu1 %vm168_vm12, %v624_v62 }
0x1030   :  { %1112 = vmatpush.msra.mxu1 %v774_v43 }
0x1032   :  { %1113 = vmatpush.msra.mxu1 %v773_v8 }
0x1034   :  { %1114 = vmatpush.msra.mxu1 %v772_v60 }
0x1036   :  { %1115 = vmatpush.msra.mxu1 %v771_v61 }
0x1047   :  { %v727_v21 = vpop.permute.xlu1 %726 }
0x1048   :  { %1361 = vmatmul.msk.f32.vlgmr.msra.gmra.mxu2 %vm168_vm12, %v727_v21 }
0x1055   :  { %v792_v7 = vpop.f32.mrf.mxu3 }
0x10ac   :  { %v644_v0 = vpop.f32.mrf.mxu1 }
0x10ad   :  { %v647_v1 = vadd.f32 %v644_v0, %v157_v63 }
0x10af   :  { %1446 = vtanh.f32 %v647_v1  ;;  %v1360_v11 = vmul.f32 -1.442695, %v647_v1 }
0x10b5   :  { %v1447_v2 = vpop.eup %1446 }
0x10b6   :  { %670 = vrot.lane.b32.xlu2 %v1447_v2, %s1601_s11 }
0x10cb   :  { %v751_v6 = vpop.f32.mrf.mxu2 }
0x10cc   :  { %v1810_v9 = vadd.f32 %v1807_v5, %v751_v6 }
0x10ce   :  { %v795_v10 = vadd.f32 %v792_v7, %v1810_v9  ;;  %v759_v25 = vrot.slane %v1810_v9, 2 }
0x10d0   :  { %1448 = vtanh.f32 %v795_v10  ;;  %v1363_v3 = vmul.f32 -1.442695, %v795_v10 }
0x10d1   :  { %1450 = vpow2.f32 %v1360_v11 }
0x10d6   :  { %v1449_v30 = vpop.eup %1448 }
0x10d7   :  { %818 = vrot.lane.b32.xlu0 %v1449_v30, %s1601_s11  ;;  %v1451_v12 = vpop.eup %1450 }
0x10d8   :  { %v651_v14 = vadd.f32 1.0, %v1451_v12 }
0x10da   :  { %1452 = vrcp.f32 %v651_v14  ;;  %v663_v20 = vand.u32 2147483648, %v651_v14  ;;  %vm657_vm2 = vweird.f32 %v651_v14  ;;  %v661_v23 = vand.u32 2147483647, %v651_v14 }
0x10db   :  { %1454 = vpow2.f32 %v1363_v3 }
0x10dc   :  { %v664_v26 = vor.u32 1.1754944e-38, %v663_v20  ;;  %vm662_vm4 = vcmp.eq.f32.partialorder %v661_v23, 8.507059e+37 }
0x10e0   :  { %v1453_v15 = vpop.eup %1452 }
0x10e1   :  { %v653_v16 = vmul.f32 %v1453_v15, %v651_v14  ;;  %vm658_vm1 = vweird.f32 %v1453_v15  ;;  %v1455_v31 = vpop.eup %1454 }
0x10e2   :  { %vm659_vm3 = vmor %vm657_vm2, %vm658_vm1  ;;  %v799_v32 = vadd.f32 1.0, %v1455_v31 }
0x10e3   :  { %v654_v17 = vsub.f32 1.0, %v653_v16 }
0x10e4   :  { %1456 = vrcp.f32 %v799_v32  ;;  %v811_v37 = vand.u32 2147483648, %v799_v32  ;;  %vm805_vm10 = vweird.f32 %v799_v32  ;;  %v809_v38 = vand.u32 2147483647, %v799_v32 }
0x10e5   :  { %v655_v18 = vmul.f32 %v1453_v15, %v654_v17 }
0x10e6   :  { %v812_v22 = vor.u32 1.1754944e-38, %v811_v37  ;;  %vm810_vm13 = vcmp.eq.f32.partialorder %v809_v38, 8.507059e+37 }
0x10e7   :  { %v656_v19 = vadd.f32 %v1453_v15, %v655_v18 }
0x10e9   :  { %v660_v24 = vsel %vm659_vm3, %v1453_v15, %v656_v19 }
0x10ea   :  { %v665_v28 = vsel %vm662_vm4, %v664_v26, %v660_v24  ;;  %v1457_v4 = vpop.eup %1456 }
0x10eb   :  { %v801_v33 = vmul.f32 %v1457_v4, %v799_v32  ;;  %vm806_vm7 = vweird.f32 %v1457_v4  ;;  %v668_v44 = vmul.f32 %v665_v28, %v1784_v45 }
0x10ec   :  { %vm807_vm11 = vmor %vm805_vm10, %vm806_vm7 }
0x10ed   :  { %v802_v34 = vsub.f32 1.0, %v801_v33 }
0x10ef   :  { %v803_v35 = vmul.f32 %v1457_v4, %v802_v34 }
0x10f1   :  { %v804_v36 = vadd.f32 %v1457_v4, %v803_v35 }
0x10f3   :  { %v808_v39 = vsel %vm807_vm11, %v1457_v4, %v804_v36 }
0x10f4   :  { %v813_v41 = vsel %vm810_vm13, %v812_v22, %v808_v39 }
0x10f5   :  { %v816_v50 = vmul.f32 0.0, %v813_v41 }
0x1110   :  { %v671_v27 = vpop.permute.xlu2 %670 }
0x1111   :  { %v673_v29 = vmul.f32 %v671_v27, %v665_v28 }
0x1113   :  { %675 = vrot.lane.b32.xlu1 %v673_v29, %s1602_s3 }
0x1149   :  { %v819_v40 = vpop.permute.xlu0 %818 }
0x114a   :  { %v821_v42 = vmul.f32 %v819_v40, %v813_v41 }
0x114c   :  { %823 = vrot.lane.b32.xlu2 %v821_v42, %s1602_s3 }
0x1185   :  { %v676_v46 = vpop.permute.xlu1 %675 }
0x1186   :  { %v678_v47 = vadd.f32 %v676_v46, %v668_v44 }
0x1188   :  { %1458 = vtanh.f32 %v678_v47 }
0x118e   :  { %v1459_v49 = vpop.eup %1458 }
0x118f   :  { %681 = vrot.lane.b32.xlu0 %v1459_v49, %s1601_s11 }
0x11a6   :  { %v824_v51 = vpop.permute.xlu2 %823 }
0x11a7   :  { %v826_v52 = vadd.f32 %v824_v51, %v816_v50 }
0x11a9   :  { %1460 = vtanh.f32 %v826_v52 }
0x11af   :  { %v1461_v54 = vpop.eup %1460 }
0x11b0   :  { %829 = vrot.lane.b32.xlu1 %v1461_v54, %s1601_s11 }
0x1201   :  { %v682_v55 = vpop.permute.xlu0 %681 }
0x1202   :  { %v684_v56 = vmul.f32 %v682_v55, %v665_v28  ;;  %v760_v28 = vrot.slane %v1810_v9, 4 }
0x1204   :  { %707 = vst [vmem:[#allocation1 + $0x3] ss:$4 sm:$0xff] %v684_v56 }
0x120b   :  { %v1821_v59 = vld.sshfl [vmem:[#allocation1] sm:$0xff pattern:$0x73625140] }
0x1222   :  { %v830_v13 = vpop.permute.xlu1 %829 }
0x1223   :  { %v832_v45 = vmul.f32 %v830_v13, %v813_v41  ;;  %v761_v13 = vrot.slane %v1810_v9, 6 }
0x1225   :  { %834 = vst [vmem:[#allocation1] ss:$4 sm:$0xff] %v832_v45 }
0x122c   :  { %v835_v43 = vld.sshfl [vmem:[#allocation1] sm:$0xff pattern:$0x73625140] }
0x122d   :  { %836 = vrot.lane.b32.xlu2 %v835_v43, %s1602_s3 }
0x1287   :  { %v837_v8 = vpop.permute.xlu2 %836 }
0x1288   :  { %1364 = vmatmul.msk.f32.vlgmr.msra.gmra.mxu0 %vm168_vm12, %v837_v8 }
0x1305   :  { %v857_v60 = vpop.f32.mrf.mxu0 }
0x1306   :  { %v860_v48 = vadd.f32 %v857_v60, %v759_v25  ;;  %v713_v25 = vsel %vm103_vm5, %v1770_v53, %v1797_v58 }
0x1307   :  { %v714_v60 = vsel %vm105_vm0, %v713_v25, %v1819_v57 }
0x1308   :  { %1462 = vtanh.f32 %v860_v48  ;;  %v1365_v62 = vmul.f32 -1.442695, %v860_v48  ;;  %v715_v48 = vsel %vm107_vm6, %v714_v60, %v1821_v59 }
0x130a   :  { %1464 = vpow2.f32 %v1365_v62 }
0x130e   :  { %v1463_v61 = vpop.eup %1462 }
0x130f   :  { %883 = vrot.lane.b32.xlu0 %v1463_v61, %s1601_s11 }
0x1310   :  { %v1465_v21 = vpop.eup %1464 }
0x1311   :  { %v864_v63 = vadd.f32 1.0, %v1465_v21 }
0x1313   :  { %1466 = vrcp.f32 %v864_v63  ;;  %v876_v10 = vand.u32 2147483648, %v864_v63  ;;  %vm870_vm15 = vweird.f32 %v864_v63  ;;  %v874_v30 = vand.u32 2147483647, %v864_v63 }
0x1315   :  { %v877_v12 = vor.u32 1.1754944e-38, %v876_v10  ;;  %vm875_vm9 = vcmp.eq.f32.partialorder %v874_v30, 8.507059e+37 }
0x1319   :  { %v1467_v0 = vpop.eup %1466 }
0x131a   :  { %v866_v1 = vmul.f32 %v1467_v0, %v864_v63  ;;  %vm871_vm14 = vweird.f32 %v1467_v0 }
0x131b   :  { %vm872_vm8 = vmor %vm870_vm15, %vm871_vm14 }
0x131c   :  { %v867_v2 = vsub.f32 1.0, %v866_v1 }
0x131e   :  { %v868_v6 = vmul.f32 %v1467_v0, %v867_v2 }
0x1320   :  { %v869_v7 = vadd.f32 %v1467_v0, %v868_v6 }
0x1322   :  { %v873_v11 = vsel %vm872_vm8, %v1467_v0, %v869_v7 }
0x1323   :  { %v878_v15 = vsel %vm875_vm9, %v877_v12, %v873_v11 }
0x1324   :  { %v881_v17 = vmul.f32 %v878_v15, %v826_v52 }
0x1381   :  { %v884_v14 = vpop.permute.xlu0 %883 }
0x1382   :  { %v886_v16 = vmul.f32 %v884_v14, %v878_v15 }
0x1384   :  { %888 = vrot.lane.b32.xlu1 %v886_v16, %s1602_s3 }
0x13f6   :  { %v889_v18 = vpop.permute.xlu1 %888 }
0x13f7   :  { %v891_v19 = vadd.f32 %v889_v18, %v881_v17 }
0x13f9   :  { %1468 = vtanh.f32 %v891_v19 }
0x13ff   :  { %v1469_v20 = vpop.eup %1468 }
0x1400   :  { %894 = vrot.lane.b32.xlu2 %v1469_v20, %s1601_s11 }
0x145a   :  { %v895_v23 = vpop.permute.xlu2 %894 }
0x145b   :  { %v897_v24 = vmul.f32 %v895_v23, %v878_v15 }
0x145d   :  { %899 = vst [vmem:[#allocation1] ss:$4 sm:$0xff] %v897_v24 }
0x1464   :  { %v900_v26 = vld.sshfl [vmem:[#allocation1] sm:$0xff pattern:$0x73625140] }
0x1465   :  { %901 = vrot.lane.b32.xlu0 %v900_v26, %s1602_s3 }
0x14d7   :  { %v902_v27 = vpop.permute.xlu0 %901 }
0x14d8   :  { %1366 = vmatmul.msk.f32.vlgmr.msrb.gmra.mxu1 %vm168_vm12, %v902_v27 }
0x1555   :  { %v922_v29 = vpop.f32.mrf.mxu1 }
0x1556   :  { %v925_v3 = vadd.f32 %v922_v29, %v760_v28 }
0x1558   :  { %1470 = vtanh.f32 %v925_v3  ;;  %v1367_v32 = vmul.f32 -1.442695, %v925_v3 }
0x155a   :  { %1472 = vpow2.f32 %v1367_v32 }
0x155e   :  { %v1471_v31 = vpop.eup %1470 }
0x155f   :  { %948 = vrot.lane.b32.xlu1 %v1471_v31, %s1601_s11 }
0x1560   :  { %v1473_v4 = vpop.eup %1472 }
0x1561   :  { %v929_v33 = vadd.f32 1.0, %v1473_v4 }
0x1563   :  { %1474 = vrcp.f32 %v929_v33  ;;  %v941_v39 = vand.u32 2147483648, %v929_v33  ;;  %vm935_vm2 = vweird.f32 %v929_v33  ;;  %v939_v22 = vand.u32 2147483647, %v929_v33 }
0x1565   :  { %v942_v41 = vor.u32 1.1754944e-38, %v941_v39  ;;  %vm940_vm4 = vcmp.eq.f32.partialorder %v939_v22, 8.507059e+37 }
0x1569   :  { %v1475_v34 = vpop.eup %1474 }
0x156a   :  { %v931_v35 = vmul.f32 %v1475_v34, %v929_v33  ;;  %vm936_vm1 = vweird.f32 %v1475_v34 }
0x156b   :  { %vm937_vm3 = vmor %vm935_vm2, %vm936_vm1 }
0x156c   :  { %v932_v36 = vsub.f32 1.0, %v931_v35 }
0x156e   :  { %v933_v37 = vmul.f32 %v1475_v34, %v932_v36 }
0x1570   :  { %v934_v38 = vadd.f32 %v1475_v34, %v933_v37 }
0x1572   :  { %v938_v40 = vsel %vm937_vm3, %v1475_v34, %v934_v38 }
0x1573   :  { %v943_v44 = vsel %vm940_vm4, %v942_v41, %v938_v40 }
0x1574   :  { %v946_v47 = vmul.f32 %v943_v44, %v891_v19 }
0x15d1   :  { %v949_v42 = vpop.permute.xlu1 %948 }
0x15d2   :  { %v951_v46 = vmul.f32 %v949_v42, %v943_v44 }
0x15d4   :  { %953 = vrot.lane.b32.xlu2 %v951_v46, %s1602_s3 }
0x162e   :  { %v954_v49 = vpop.permute.xlu2 %953 }
0x162f   :  { %v956_v50 = vadd.f32 %v954_v49, %v946_v47 }
0x1631   :  { %1476 = vtanh.f32 %v956_v50 }
0x1637   :  { %v1477_v51 = vpop.eup %1476 }
0x1638   :  { %959 = vrot.lane.b32.xlu0 %v1477_v51, %s1601_s11 }
0x16aa   :  { %v960_v52 = vpop.permute.xlu0 %959 }
0x16ab   :  { %v962_v54 = vmul.f32 %v960_v52, %v943_v44 }
0x16ad   :  { %964 = vst [vmem:[#allocation1] ss:$4 sm:$0xff] %v962_v54 }
0x16b4   :  { %v965_v55 = vld.sshfl [vmem:[#allocation1] sm:$0xff pattern:$0x73625140] }
0x16b5   :  { %966 = vrot.lane.b32.xlu1 %v965_v55, %s1602_s3 }
0x1727   :  { %v967_v56 = vpop.permute.xlu1 %966 }
0x1728   :  { %1368 = vmatmul.msk.f32.vlgmr.msrb.gmra.mxu3 %vm168_vm12, %v967_v56 }
0x17ab   :  { %v987_v45 = vpop.f32.mrf.mxu3 }
0x17ac   :  { %v990_v43 = vadd.f32 %v987_v45, %v761_v13 }
0x17ae   :  { %1478 = vtanh.f32 %v990_v43  ;;  %v1369_v61 = vmul.f32 -1.442695, %v990_v43 }
0x17b0   :  { %1480 = vpow2.f32 %v1369_v61 }
0x17b4   :  { %v1479_v8 = vpop.eup %1478 }
0x17b5   :  { %1013 = vrot.lane.b32.xlu2 %v1479_v8, %s1601_s11 }
0x17b6   :  { %v1481_v9 = vpop.eup %1480 }
0x17b7   :  { %v994_v62 = vadd.f32 1.0, %v1481_v9 }
0x17b9   :  { %1482 = vrcp.f32 %v994_v62  ;;  %v1006_v53 = vand.u32 2147483648, %v994_v62  ;;  %vm1000_vm5 = vweird.f32 %v994_v62  ;;  %v1004_v58 = vand.u32 2147483647, %v994_v62 }
0x17bb   :  { %v1007_v6 = vor.u32 1.1754944e-38, %v1006_v53  ;;  %vm1005_vm6 = vcmp.eq.f32.partialorder %v1004_v58, 8.507059e+37 }
0x17bd   :  { %728 = vrot.lane.b32.xlu2 %v715_v48, %s1602_s3 }
0x17bf   :  { %v1483_v21 = vpop.eup %1482 }
0x17c0   :  { %v996_v63 = vmul.f32 %v1483_v21, %v994_v62  ;;  %vm1001_vm7 = vweird.f32 %v1483_v21 }
0x17c1   :  { %vm1002_vm0 = vmor %vm1000_vm5, %vm1001_vm7 }
0x17c2   :  { %v997_v0 = vsub.f32 1.0, %v996_v63 }
0x17c4   :  { %v998_v1 = vmul.f32 %v1483_v21, %v997_v0 }
0x17c6   :  { %v999_v2 = vadd.f32 %v1483_v21, %v998_v1 }
0x17c8   :  { %v1003_v57 = vsel %vm1002_vm0, %v1483_v21, %v999_v2 }
0x17c9   :  { %v1008_v7 = vsel %vm1005_vm6, %v1007_v6, %v1003_v57 }
0x17ca   :  { %v1011_v11 = vmul.f32 %v1008_v7, %v956_v50 }
0x180f   :  { %v1014_v59 = vpop.permute.xlu2 %1013 }
0x1810   :  { %v1016_v10 = vmul.f32 %v1014_v59, %v1008_v7 }
0x1812   :  { %1018 = vrot.lane.b32.xlu0 %v1016_v10, %s1602_s3 }
0x1817   :  { %v729_v30 = vpop.permute.xlu2 %728 }
0x1818   :  { %1362 = vmatmul.msk.f32.gmra.mxu2 %vm168_vm12, %v729_v30 }
0x1884   :  { %v1019_v12 = vpop.permute.xlu0 %1018 }
0x1885   :  { %v1021_v14 = vadd.f32 %v1019_v12, %v1011_v11 }
0x1887   :  { %1484 = vtanh.f32 %v1021_v14 }
0x188d   :  { %v1485_v15 = vpop.eup %1484 }
0x188e   :  { %1024 = vrot.lane.b32.xlu1 %v1485_v15, %s1601_s11 }
0x189b   :  { %v754_v20 = vpop.f32.mrf.mxu2 }
0x189c   :  { %v1853_v23 = vadd.f32 %v1807_v5, %v754_v20 }
0x189e   :  { %v762_v51 = vrot.slane %v1853_v23, 2  ;;  %v763_v30 = vrot.slane %v1853_v23, 4 }
0x1900   :  { %v1025_v16 = vpop.permute.xlu1 %1024 }
0x1901   :  { %v1027_v17 = vmul.f32 %v1025_v16, %v1008_v7 }
0x1903   :  { %1029 = vst [vmem:[#allocation1] ss:$4 sm:$0xff] %v1027_v17 }
0x190a   :  { %v1030_v18 = vld.sshfl [vmem:[#allocation1] sm:$0xff pattern:$0x73625140] }
0x190b   :  { %1031 = vrot.lane.b32.xlu0 %v1030_v18, %s1602_s3 }
0x197d   :  { %v1032_v19 = vpop.permute.xlu0 %1031 }
0x197e   :  { %1370 = vmatmul.msk.f32.vlgmr.msrb.gmra.mxu0 %vm168_vm12, %v1032_v19 }
0x19fb   :  { %v1052_v24 = vpop.f32.mrf.mxu0 }
0x19fc   :  { %v1055_v26 = vadd.f32 %v1052_v24, %v1853_v23 }
0x19fe   :  { %1486 = vtanh.f32 %v1055_v26  ;;  %v1371_v28 = vmul.f32 -1.442695, %v1055_v26 }
0x1a00   :  { %1488 = vpow2.f32 %v1371_v28 }
0x1a04   :  { %v1487_v27 = vpop.eup %1486 }
0x1a05   :  { %1078 = vrot.lane.b32.xlu1 %v1487_v27, %s1601_s11 }
0x1a06   :  { %v1489_v29 = vpop.eup %1488 }
0x1a07   :  { %v1059_v3 = vadd.f32 1.0, %v1489_v29 }
0x1a09   :  { %1490 = vrcp.f32 %v1059_v3  ;;  %v1071_v5 = vand.u32 2147483648, %v1059_v3  ;;  %vm1065_vm11 = vweird.f32 %v1059_v3  ;;  %v1069_v35 = vand.u32 2147483647, %v1059_v3 }
0x1a0b   :  { %v1072_v37 = vor.u32 1.1754944e-38, %v1071_v5  ;;  %vm1070_vm14 = vcmp.eq.f32.partialorder %v1069_v35, 8.507059e+37 }
0x1a0f   :  { %v1491_v31 = vpop.eup %1490 }
0x1a10   :  { %v1061_v32 = vmul.f32 %v1491_v31, %v1059_v3  ;;  %vm1066_vm10 = vweird.f32 %v1491_v31 }
0x1a11   :  { %vm1067_vm13 = vmor %vm1065_vm11, %vm1066_vm10  ;;  %vm1323_vm11 = vcmask 17408  }
0x1a12   :  { %v1062_v4 = vsub.f32 1.0, %v1061_v32 }
0x1a14   :  { %v1063_v33 = vmul.f32 %v1491_v31, %v1062_v4 }
0x1a16   :  { %v1064_v34 = vadd.f32 %v1491_v31, %v1063_v33 }
0x1a18   :  { %v1068_v36 = vsel %vm1067_vm13, %v1491_v31, %v1064_v34 }
0x1a19   :  { %v1073_v39 = vsel %vm1070_vm14, %v1072_v37, %v1068_v36 }
0x1a1a   :  { %v1076_v40 = vmul.f32 %v1073_v39, %v1021_v14 }
0x1a77   :  { %v1079_v38 = vpop.permute.xlu1 %1078 }
0x1a78   :  { %v1081_v22 = vmul.f32 %v1079_v38, %v1073_v39 }
0x1a7a   :  { %1083 = vrot.lane.b32.xlu2 %v1081_v22, %s1602_s3  ;;  %v764_v22 = vrot.slane %v1853_v23, 6 }
0x1ad4   :  { %v1084_v41 = vpop.permute.xlu2 %1083 }
0x1ad5   :  { %v1086_v42 = vadd.f32 %v1084_v41, %v1076_v40 }
0x1ad7   :  { %1492 = vtanh.f32 %v1086_v42 }
0x1add   :  { %v1493_v44 = vpop.eup %1492 }
0x1ade   :  { %1089 = vrot.lane.b32.xlu0 %v1493_v44, %s1601_s11 }
0x1b50   :  { %v1090_v46 = vpop.permute.xlu0 %1089 }
0x1b51   :  { %v1092_v47 = vmul.f32 %v1090_v46, %v1073_v39 }
0x1b53   :  { %1094 = vst [vmem:[#allocation1] ss:$4 sm:$0xff] %v1092_v47 }
0x1b5a   :  { %v1095_v49 = vld.sshfl [vmem:[#allocation1] sm:$0xff pattern:$0x73625140] }
0x1b5b   :  { %1096 = vrot.lane.b32.xlu1 %v1095_v49, %s1602_s3 }
0x1bcd   :  { %v1097_v50 = vpop.permute.xlu1 %1096 }
0x1bce   :  { %1372 = vmatmul.msk.f32.vlgmr.msra.gmra.mxu1 %vm168_vm12, %v1097_v50 }
0x1c4b   :  { %v1117_v52 = vpop.f32.mrf.mxu1 }
0x1c4c   :  { %v1120_v54 = vadd.f32 %v1117_v52, %v762_v51 }
0x1c4e   :  { %1494 = vtanh.f32 %v1120_v54  ;;  %v1373_v56 = vmul.f32 -1.442695, %v1120_v54 }
0x1c50   :  { %1496 = vpow2.f32 %v1373_v56 }
0x1c54   :  { %v1495_v55 = vpop.eup %1494 }
0x1c55   :  { %1143 = vrot.lane.b32.xlu2 %v1495_v55, %s1601_s11 }
0x1c56   :  { %v1497_v13 = vpop.eup %1496 }
0x1c57   :  { %v1124_v45 = vadd.f32 1.0, %v1497_v13 }
0x1c59   :  { %1498 = vrcp.f32 %v1124_v45  ;;  %v1136_v61 = vand.u32 2147483648, %v1124_v45  ;;  %vm1130_vm8 = vweird.f32 %v1124_v45  ;;  %v1134_v9 = vand.u32 2147483647, %v1124_v45 }
0x1c5b   :  { %v1137_v21 = vor.u32 1.1754944e-38, %v1136_v61  ;;  %vm1135_vm1 = vcmp.eq.f32.partialorder %v1134_v9, 8.507059e+37  ;;  %v1291_v9 = vld [vmem:[%s1904_s7 + $0x18] sm:$0xff] }
0x1c5c   :  { %1315 = vmatpush.msra.mxu0 %v1291_v9 }
0x1c5f   :  { %v1499_v43 = vpop.eup %1498 }
0x1c60   :  { %v1126_v8 = vmul.f32 %v1499_v43, %v1124_v45  ;;  %vm1131_vm15 = vweird.f32 %v1499_v43 }
0x1c61   :  { %vm1132_vm9 = vmor %vm1130_vm8, %vm1131_vm15 }
0x1c62   :  { %v1127_v25 = vsub.f32 1.0, %v1126_v8 }
0x1c64   :  { %v1128_v60 = vmul.f32 %v1499_v43, %v1127_v25 }
0x1c66   :  { %v1129_v48 = vadd.f32 %v1499_v43, %v1128_v60 }
0x1c68   :  { %v1133_v62 = vsel %vm1132_vm9, %v1499_v43, %v1129_v48 }
0x1c69   :  { %v1138_v0 = vsel %vm1135_vm1, %v1137_v21, %v1133_v62  ;;  %v1290_v62 = vld [vmem:[%s1904_s7 + $0x10] sm:$0xff]  ;;  %v1289_v21 = vld [vmem:[%s1904_s7 + $0x8] sm:$0xff] }
0x1c6a   :  { %v1141_v2 = vmul.f32 %v1138_v0, %v1086_v42  ;;  %1316 = vmatpush.msra.mxu0 %v1290_v62 }
0x1c6c   :  { %1317 = vmatpush.msra.mxu0 %v1289_v21 }
0x1caf   :  { %v1144_v63 = vpop.permute.xlu2 %1143 }
0x1cb0   :  { %v1146_v1 = vmul.f32 %v1144_v63, %v1138_v0  ;;  %v1288_v63 = vld [vmem:[%s1904_s7] sm:$0xff]  ;;  %s1332_s7 = sshll.u32 %s1906_s9, 4  ;;  %s1333_s7 = int_to_ptr.hbm [resolvable:$true] %s1332_s7 }
0x1cb1   :  { %1318 = vmatpush.msra.mxu0 %v1288_v63 }
0x1cb2   :  { %1148 = vrot.lane.b32.xlu0 %v1146_v1, %s1602_s3 }
0x1d24   :  { %v1149_v53 = vpop.permute.xlu0 %1148 }
0x1d25   :  { %v1151_v58 = vadd.f32 %v1149_v53, %v1141_v2 }
0x1d27   :  { %1500 = vtanh.f32 %v1151_v58 }
0x1d2d   :  { %v1501_v57 = vpop.eup %1500 }
0x1d2e   :  { %1154 = vrot.lane.b32.xlu1 %v1501_v57, %s1601_s11 }
0x1da0   :  { %v1155_v6 = vpop.permute.xlu1 %1154 }
0x1da1   :  { %v1157_v59 = vmul.f32 %v1155_v6, %v1138_v0 }
0x1da3   :  { %1159 = vst [vmem:[#allocation1] ss:$4 sm:$0xff] %v1157_v59 }
0x1daa   :  { %v1160_v7 = vld.sshfl [vmem:[#allocation1] sm:$0xff pattern:$0x73625140] }
0x1dab   :  { %1161 = vrot.lane.b32.xlu2 %v1160_v7, %s1602_s3 }
0x1e05   :  { %v1162_v10 = vpop.permute.xlu2 %1161 }
0x1e06   :  { %1374 = vmatmul.msk.f32.vlgmr.msrb.gmra.mxu2 %vm168_vm12, %v1162_v10 }
0x1e89   :  { %v1182_v11 = vpop.f32.mrf.mxu2 }
0x1e8a   :  { %v1185_v12 = vadd.f32 %v1182_v11, %v763_v30 }
0x1e8c   :  { %1502 = vtanh.f32 %v1185_v12  ;;  %v1375_v15 = vmul.f32 -1.442695, %v1185_v12 }
0x1e8e   :  { %1504 = vpow2.f32 %v1375_v15 }
0x1e92   :  { %v1503_v14 = vpop.eup %1502 }
0x1e93   :  { %1208 = vrot.lane.b32.xlu0 %v1503_v14, %s1601_s11 }
0x1e94   :  { %v1505_v16 = vpop.eup %1504 }
0x1e95   :  { %v1189_v17 = vadd.f32 1.0, %v1505_v16 }
0x1e97   :  { %1506 = vrcp.f32 %v1189_v17  ;;  %v1201_v27 = vand.u32 2147483648, %v1189_v17  ;;  %vm1195_vm3 = vweird.f32 %v1189_v17  ;;  %v1199_v28 = vand.u32 2147483647, %v1189_v17 }
0x1e99   :  { %v1202_v3 = vor.u32 1.1754944e-38, %v1201_v27  ;;  %vm1200_vm7 = vcmp.eq.f32.partialorder %v1199_v28, 8.507059e+37 }
0x1e9d   :  { %v1507_v18 = vpop.eup %1506 }
0x1e9e   :  { %v1191_v19 = vmul.f32 %v1507_v18, %v1189_v17  ;;  %vm1196_vm2 = vweird.f32 %v1507_v18 }
0x1e9f   :  { %vm1197_vm4 = vmor %vm1195_vm3, %vm1196_vm2 }
0x1ea0   :  { %v1192_v20 = vsub.f32 1.0, %v1191_v19 }
0x1ea2   :  { %v1193_v24 = vmul.f32 %v1507_v18, %v1192_v20 }
0x1ea4   :  { %v1194_v26 = vadd.f32 %v1507_v18, %v1193_v24 }
0x1ea6   :  { %v1198_v29 = vsel %vm1197_vm4, %v1507_v18, %v1194_v26 }
0x1ea7   :  { %v1203_v32 = vsel %vm1200_vm7, %v1202_v3, %v1198_v29 }
0x1ea8   :  { %v1206_v33 = vmul.f32 %v1203_v32, %v1151_v58  ;;  %v1389_v58 = vld [vmem:[%s1905_s8] ss:$0 sm:$0xff] }
0x1f05   :  { %v1209_v31 = vpop.permute.xlu0 %1208 }
0x1f06   :  { %v1211_v4 = vmul.f32 %v1209_v31, %v1203_v32 }
0x1f08   :  { %1213 = vrot.lane.b32.xlu1 %v1211_v4, %s1602_s3 }
0x1f7a   :  { %v1214_v34 = vpop.permute.xlu1 %1213 }
0x1f7b   :  { %v1216_v5 = vadd.f32 %v1214_v34, %v1206_v33 }
0x1f7d   :  { %1508 = vtanh.f32 %v1216_v5 }
0x1f83   :  { %v1509_v35 = vpop.eup %1508 }
0x1f84   :  { %1219 = vrot.lane.b32.xlu2 %v1509_v35, %s1601_s11 }
0x1fde   :  { %v1220_v36 = vpop.permute.xlu2 %1219 }
0x1fdf   :  { %v1222_v37 = vmul.f32 %v1220_v36, %v1203_v32 }
0x1fe1   :  { %1224 = vst [vmem:[#allocation1] ss:$4 sm:$0xff] %v1222_v37 }
0x1fe8   :  { %v1225_v38 = vld.sshfl [vmem:[#allocation1] sm:$0xff pattern:$0x73625140] }
0x1fe9   :  { %1226 = vrot.lane.b32.xlu0 %v1225_v38, %s1602_s3 }
0x205b   :  { %v1227_v39 = vpop.permute.xlu0 %1226 }
0x205c   :  { %1376 = vmatmul.msk.f32.vlgmr.msra.gmra.mxu3 %vm168_vm12, %v1227_v39 }
0x20df   :  { %v1247_v40 = vpop.f32.mrf.mxu3 }
0x20e0   :  { %v1250_v41 = vadd.f32 %v1247_v40, %v764_v22 }
0x20e2   :  { %1510 = vtanh.f32 %v1250_v41  ;;  %v1377_v44 = vmul.f32 -1.442695, %v1250_v41 }
0x20e4   :  { %1512 = vpow2.f32 %v1377_v44 }
0x20e8   :  { %v1511_v42 = vpop.eup %1510 }
0x20e9   :  { %1273 = vrot.lane.b32.xlu1 %v1511_v42, %s1601_s11 }
0x20ea   :  { %v1513_v46 = vpop.eup %1512 }
0x20eb   :  { %v1254_v47 = vadd.f32 1.0, %v1513_v46 }
0x20ed   :  { %1514 = vrcp.f32 %v1254_v47  ;;  %v1266_v55 = vand.u32 2147483648, %v1254_v47  ;;  %vm1260_vm0 = vweird.f32 %v1254_v47  ;;  %v1264_v23 = vand.u32 2147483647, %v1254_v47 }
0x20ef   :  { %v1267_v13 = vor.u32 1.1754944e-38, %v1266_v55  ;;  %vm1265_vm10 = vcmp.eq.f32.partialorder %v1264_v23, 8.507059e+37 }
0x20f3   :  { %v1515_v49 = vpop.eup %1514 }
0x20f4   :  { %v1256_v50 = vmul.f32 %v1515_v49, %v1254_v47  ;;  %vm1261_vm5 = vweird.f32 %v1515_v49 }
0x20f5   :  { %vm1262_vm6 = vmor %vm1260_vm0, %vm1261_vm5 }
0x20f6   :  { %v1257_v51 = vsub.f32 1.0, %v1256_v50 }
0x20f8   :  { %v1258_v52 = vmul.f32 %v1515_v49, %v1257_v51 }
0x20fa   :  { %v1259_v54 = vadd.f32 %v1515_v49, %v1258_v52 }
0x20fc   :  { %v1263_v56 = vsel %vm1262_vm6, %v1515_v49, %v1259_v54 }
0x20fd   :  { %v1268_v43 = vsel %vm1265_vm10, %v1267_v13, %v1263_v56 }
0x20fe   :  { %v1271_v25 = vmul.f32 %v1268_v43, %v1216_v5 }
0x215b   :  { %v1274_v45 = vpop.permute.xlu1 %1273 }
0x215c   :  { %v1276_v8 = vmul.f32 %v1274_v45, %v1268_v43 }
0x215e   :  { %1278 = vrot.lane.b32.xlu2 %v1276_v8, %s1602_s3 }
0x21b8   :  { %v1279_v60 = vpop.permute.xlu2 %1278 }
0x21b9   :  { %v1281_v48 = vadd.f32 %v1279_v60, %v1271_v25 }
0x21bb   :  { %1516 = vtanh.f32 %v1281_v48 }
0x21c1   :  { %v1517_v61 = vpop.eup %1516 }
0x21c2   :  { %1284 = vrot.lane.b32.xlu0 %v1517_v61, %s1601_s11 }
0x2234   :  { %v1285_v0 = vpop.permute.xlu0 %1284 }
0x2235   :  { %v1287_v1 = vmul.f32 %v1285_v0, %v1268_v43 }
0x2237   :  { %1297 = vst [vmem:[#allocation1] ss:$4 sm:$0xff] %v1287_v1 }
0x223e   :  { %v1298_v2 = vld.sshfl [vmem:[#allocation1] sm:$0xff pattern:$0x73625140] }
0x223f   :  { %1299 = vrot.lane.b32.xlu1 %v1298_v2, %s1602_s3 }
0x22b1   :  { %v1300_v53 = vpop.permute.xlu1 %1299 }
0x22b2   :  { %1378 = vmatmul.msk.f32.vlgmr.msra.gmra.mxu0 %vm168_vm12, %v1300_v53 }
0x232f   :  { %v1320_v57 = vpop.f32.mrf.mxu0 }
0x2330   :  { %v1321_v6 = vadd.f32 %v1389_v58, %v1320_v57 }
0x2332   :  { %1324 = vst.msk [vmem:[#allocation7] sm:$0x3] %vm1323_vm11, %v1321_v6 }
0x2333   :  { %1335 = dma.vmem_to_hbm [thread:$0]  %s1331_s23, 32, %s1333_s7, [#allocation4]  }
0x2334   :  { %1594 = dma.done.wait [#allocation4], 32  }
0x2335   :  { %1595 = vsyncadd [#allocation4], 4294967264 }
0x2336   :  { %1340 = vsyncpa [#allocation3], 1 }
0x2337   :  { %1341 = vsyncpa [#allocation6], 1 }
0x2338   :  { %1342 = vsyncpa [#allocation4], 1 }

</bundles_post_ra>
